<compile_context>
chip_gen: v6e
topology: v6e:2x2x1
jax: 0.10.0
libtpu: 0.0.40
codegen_flags: <defaults>
</compile_context>

<pallas_src>
import math
import functools

import jax
import jax.numpy as jnp
from jax.experimental import pallas as pl
from jax.experimental.pallas import tpu as pltpu


# ----------------------------------------------------------------------------
# elementwise helpers usable inside kernels
# ----------------------------------------------------------------------------
_INV_SQRT2 = 1.0 / math.sqrt(2.0)


def _erf(x):
    # Abramowitz & Stegun 7.1.26 rational approximation, |err| <= 1.5e-7.
    # Only exp/abs/where -> guaranteed Mosaic lowering (exp goes to the EUP slot).
    a1, a2, a3, a4, a5 = 0.254829592, -0.284496736, 1.421413741, -1.453152027, 1.061405429
    p = 0.3275911
    s = jnp.where(x >= 0.0, 1.0, -1.0)
    ax = jnp.abs(x)
    t = 1.0 / (1.0 + p * ax)
    poly = ((((a5 * t + a4) * t + a3) * t + a2) * t + a1) * t
    return s * (1.0 - poly * jnp.exp(-ax * ax))


def _gelu(x):
    # exact (erf-based) GELU, matching torch.nn.GELU() default
    return 0.5 * x * (1.0 + _erf(x * _INV_SQRT2))


def _matmul_t(x, w):
    # x @ w.T with PyTorch Linear weight layout (out_features, in_features).
    # Callers pass bf16 inputs; accumulation is f32 on the MXU.
    return jax.lax.dot_general(
        x, w, (((1,), (1,)), ((), ())), preferred_element_type=jnp.float32
    )


def _layernorm(x, gamma, beta, eps):
    mu = jnp.mean(x, axis=-1, keepdims=True)
    xc = x - mu
    var = jnp.mean(xc * xc, axis=-1, keepdims=True)
    return xc * jax.lax.rsqrt(var + eps) * gamma + beta


# ----------------------------------------------------------------------------
# fully fused decoder-layer kernel (one batch element per grid step)
# ----------------------------------------------------------------------------
def _decoder_layer_kernel(*refs, n_head, d_k, d_v, scale, has_mask, eps_attn, eps_ffn):
    if has_mask:
        (dec_ref, enc_ref, mask_ref,
         wq_ref, bq_ref, wkv_ref, bkv_ref, fcw_ref, fcb_ref, g1_ref, bln1_ref,
         w1_ref, b1_ref, w2_ref, b2_ref, w3_ref, b3_ref, g2_ref, bln2_ref,
         o_ref, attn_ref) = refs
    else:
        (dec_ref, enc_ref,
         wq_ref, bq_ref, wkv_ref, bkv_ref, fcw_ref, fcb_ref, g1_ref, bln1_ref,
         w1_ref, b1_ref, w2_ref, b2_ref, w3_ref, b3_ref, g2_ref, bln2_ref,
         o_ref, attn_ref) = refs
        mask_ref = None

    dec = dec_ref[0]                                   # (Sq, D) f32 (also the MHA residual)
    enc = enc_ref[0]                                   # (Sk, D) f32
    hk = n_head * d_k

    # --- fused projections: one matmul for Q, one for concatenated [K|V] ---
    q = _matmul_t(dec.astype(jnp.bfloat16), wq_ref[...]) + bq_ref[...]      # (Sq, H*dk)
    kv = _matmul_t(enc.astype(jnp.bfloat16), wkv_ref[...]) + bkv_ref[...]   # (Sk, H*(dk+dv))

    fc_w = fcw_ref[...]                                # (D, H*dv) bf16
    if has_mask:
        bias = mask_ref[0]                             # (Sq, Sk) f32 additive bias

    # --- attention epilogue fused with the output projection:
    #   out = sum_h softmax(q_h k_h^T * scale) v_h @ fc_w[:, h*dv:(h+1)*dv].T
    acc = jnp.zeros(dec.shape, jnp.float32)            # (Sq, D)
    for h in range(n_head):                            # static unroll, heads sliced in-register
        q_h = q[:, h * d_k:(h + 1) * d_k].astype(jnp.bfloat16)
        k_h = kv[:, h * d_k:(h + 1) * d_k].astype(jnp.bfloat16)
        v_h = kv[:, hk + h * d_v:hk + (h + 1) * d_v].astype(jnp.bfloat16)

        s = jax.lax.dot_general(q_h, k_h, (((1,), (1,)), ((), ())),
                                preferred_element_type=jnp.float32) * scale
        if has_mask:
            s = s + bias
        s = s - jnp.max(s, axis=-1, keepdims=True)          # f32 softmax stats
        p = jnp.exp(s)
        p = p * pl.reciprocal(jnp.sum(p, axis=-1, keepdims=True), approx=True)
        attn_ref[0, h, :, :] = p

        o_h = jnp.dot(p.astype(jnp.bfloat16), v_h,
                      preferred_element_type=jnp.float32)    # (Sq, dv)
        acc = acc + jax.lax.dot_general(
            o_h.astype(jnp.bfloat16), fc_w[:, h * d_v:(h + 1) * d_v],
            (((1,), (1,)), ((), ())), preferred_element_type=jnp.float32)

    attn_out = acc + fcb_ref[...]
    x = _layernorm(attn_out, g1_ref[...], bln1_ref[...], eps_attn) + dec   # post-LN + residual

    # --- PositionwiseFeedForward fused in the same kernel (no HBM round trip) ---
    h1 = _gelu(_matmul_t(x.astype(jnp.bfloat16), w1_ref[...]) + b1_ref[...])
    h2 = _gelu(_matmul_t(h1.astype(jnp.bfloat16), w2_ref[...]) + b2_ref[...])
    y = _matmul_t(h2.astype(jnp.bfloat16), w3_ref[...]) + b3_ref[...]
    o_ref[0, :, :] = _layernorm(y, g2_ref[...], bln2_ref[...], eps_ffn) + x  # LN then +residual


def _resident_spec(shape):
    zeros = (0,) * len(shape)
    return pl.BlockSpec(shape, lambda b, _z=zeros: _z)


# ----------------------------------------------------------------------------
# module-level forward
# ----------------------------------------------------------------------------
def decoder_layer_forward(decoder_input, encoder_output, params,
                          n_head, d_k, d_v, cross_attn_mask=None,
                          eps_attn=1e-6, eps_ffn=1e-6):
    B, Sq, D = decoder_input.shape
    Sk = encoder_output.shape[1]
    hk, hv = n_head * d_k, n_head * d_v

    pa, pf = params["cross_attn"], params["ffn"]
    Hd = pf["fc1_w"].shape[0]

    # bf16 weights at the pallas_call boundary -> halves weight HBM/VMEM traffic.
    wq = pa["wq_w"].astype(jnp.bfloat16)
    wkv = jnp.concatenate([pa["wk_w"], pa["wv_w"]], axis=0).astype(jnp.bfloat16)
    bq = pa["wq_b"].reshape(1, hk)
    bkv = jnp.concatenate([pa["wk_b"], pa["wv_b"]], axis=0).reshape(1, hk + hv)
    fc_w = pa["fc_w"].astype(jnp.bfloat16)
    fc_b = pa["fc_b"].reshape(1, D)
    g1 = pa["ln_g"].reshape(1, D)
    bln1 = pa["ln_b"].reshape(1, D)

    w1 = pf["fc1_w"].astype(jnp.bfloat16)
    w2 = pf["fc2_w"].astype(jnp.bfloat16)
    w3 = pf["fc3_w"].astype(jnp.bfloat16)
    b1 = pf["fc1_b"].reshape(1, Hd)
    b2 = pf["fc2_b"].reshape(1, Hd)
    b3 = pf["fc3_b"].reshape(1, D)
    g2 = pf["ln_g"].reshape(1, D)
    bln2 = pf["ln_b"].reshape(1, D)

    has_mask = cross_attn_mask is not None
    kernel = functools.partial(
        _decoder_layer_kernel, n_head=n_head, d_k=d_k, d_v=d_v,
        scale=1.0 / math.sqrt(d_k), has_mask=has_mask,
        eps_attn=eps_attn, eps_ffn=eps_ffn)

    args = [decoder_input, encoder_output]
    in_specs = [
        pl.BlockSpec((1, Sq, D), lambda b: (b, 0, 0)),
        pl.BlockSpec((1, Sk, D), lambda b: (b, 0, 0)),
    ]
    if has_mask:
        bias = jnp.where(
            jnp.broadcast_to(cross_attn_mask.astype(bool).reshape(B, -1, Sk), (B, Sq, Sk)),
            0.0, -1e9).astype(jnp.float32)
        args.append(bias)
        in_specs.append(pl.BlockSpec((1, Sq, Sk), lambda b: (b, 0, 0)))

    args += [wq, bq, wkv, bkv, fc_w, fc_b, g1, bln1,
             w1, b1, w2, b2, w3, b3, g2, bln2]
    in_specs += [
        _resident_spec((hk, D)),
        _resident_spec((1, hk)),
        _resident_spec((hk + hv, D)),
        _resident_spec((1, hk + hv)),
        _resident_spec((D, hv)),
        _resident_spec((1, D)),
        _resident_spec((1, D)),
        _resident_spec((1, D)),
        _resident_spec((Hd, D)),
        _resident_spec((1, Hd)),
        _resident_spec((Hd, Hd)),
        _resident_spec((1, Hd)),
        _resident_spec((D, Hd)),
        _resident_spec((1, D)),
        _resident_spec((1, D)),
        _resident_spec((1, D)),
    ]

    out, attn = pl.pallas_call(
        kernel,
        out_shape=(jax.ShapeDtypeStruct((B, Sq, D), jnp.float32),
                   jax.ShapeDtypeStruct((B, n_head, Sq, Sk), jnp.float32)),
        grid=(B,),
        in_specs=in_specs,
        out_specs=(pl.BlockSpec((1, Sq, D), lambda b: (b, 0, 0)),
                   pl.BlockSpec((1, n_head, Sq, Sk), lambda b: (b, 0, 0, 0))),
        compiler_params=pltpu.CompilerParams(dimension_semantics=("parallel",)),
    )(*args)
    return out, 1, attn


# ----------------------------------------------------------------------------
# deterministic parameter init (shapes from module __init__)
# ----------------------------------------------------------------------------
def init_params(key, n_head, d_model, d_k, d_v, n_layers):
    d_hid = d_model * 8
    ks = list(jax.random.split(key, 20))

    def lin_default(kw, kb, out_f, in_f):
        bound = 1.0 / math.sqrt(in_f)
        w = jax.random.uniform(kw, (out_f, in_f), jnp.float32, -bound, bound)
        b = jax.random.uniform(kb, (out_f,), jnp.float32, -bound, bound)
        return w, b

    def kaiming_uniform(k, out_f, in_f):
        bound = math.sqrt(6.0 / in_f)  # gain sqrt(2) * sqrt(3 / fan_in)
        return jax.random.uniform(k, (out_f, in_f), jnp.float32, -bound, bound)

    wq_w, wq_b = lin_default(ks[0], ks[1], n_head * d_k, d_model)
    wk_w, wk_b = lin_default(ks[2], ks[3], n_head * d_k, d_model)
    wv_w, wv_b = lin_default(ks[4], ks[5], n_head * d_v, d_model)
    fc_w, fc_b = lin_default(ks[6], ks[7], d_model, n_head * d_v)
    cross_attn = dict(
        wq_w=wq_w, wq_b=wq_b, wk_w=wk_w, wk_b=wk_b, wv_w=wv_w, wv_b=wv_b,
        fc_w=fc_w, fc_b=fc_b,
        ln_g=jnp.ones((d_model,), jnp.float32),
        ln_b=jnp.zeros((d_model,), jnp.float32),
    )

    fc1_w = kaiming_uniform(ks[8], d_hid, d_model)
    _, fc1_b = lin_default(ks[9], ks[10], d_hid, d_model)
    fc2_w = kaiming_uniform(ks[11], d_hid, d_hid)
    _, fc2_b = lin_default(ks[12], ks[13], d_hid, d_hid)
    fc3_w = (0.02 / math.sqrt(2 * n_layers)) * jax.random.normal(
        ks[14], (d_model, d_hid), jnp.float32)
    _, fc3_b = lin_default(ks[15], ks[16], d_model, d_hid)
    ffn = dict(
        fc1_w=fc1_w, fc1_b=fc1_b, fc2_w=fc2_w, fc2_b=fc2_b,
        fc3_w=fc3_w, fc3_b=fc3_b,
        ln_g=jnp.ones((d_model,), jnp.float32),
        ln_b=jnp.zeros((d_model,), jnp.float32),
    )
    # TODO(synk): masked_attn parameters exist in __init__ but are unused in forward; skipped.
    return dict(cross_attn=cross_attn, ffn=ffn)


if __name__ == "__main__":
    B, S_dec, S_enc = 2, 8, 8
    n_head, d_model, d_k, d_v, n_layers = 4, 32, 8, 8, 2

    key = jax.random.PRNGKey(0)
    k_in1, k_in2, k_par = jax.random.split(key, 3)
    decoder_input = jax.random.normal(k_in1, (B, S_dec, d_model), jnp.float32)
    encoder_output = jax.random.normal(k_in2, (B, S_enc, d_model), jnp.float32)

    params = init_params(k_par, n_head, d_model, d_k, d_v, n_layers)

    dec_output, one, cross_attn = decoder_layer_forward(
        decoder_input, encoder_output, params, n_head, d_k, d_v,
        cross_attn_mask=None)

    jax.block_until_ready(dec_output)
    jax.block_until_ready(cross_attn)
    assert dec_output.shape == (B, S_dec, d_model)
    assert cross_attn.shape == (B, n_head, S_dec, S_enc)
    assert one == 1
    print("KERNEL_OK")
</pallas_src>

<mosaic_0001>
module attributes {stable_mosaic.version = 11 : i64} {
  func.func @_decoder_layer_kernel(%arg0: i32, %arg1: memref<1x8x32xf32, #tpu.memory_space<vmem>>, %arg2: memref<1x8x32xf32, #tpu.memory_space<vmem>>, %arg3: memref<32x32xbf16, #tpu.memory_space<vmem>>, %arg4: memref<1x32xf32, #tpu.memory_space<vmem>>, %arg5: memref<64x32xbf16, #tpu.memory_space<vmem>>, %arg6: memref<1x64xf32, #tpu.memory_space<vmem>>, %arg7: memref<32x32xbf16, #tpu.memory_space<vmem>>, %arg8: memref<1x32xf32, #tpu.memory_space<vmem>>, %arg9: memref<1x32xf32, #tpu.memory_space<vmem>>, %arg10: memref<1x32xf32, #tpu.memory_space<vmem>>, %arg11: memref<256x32xbf16, #tpu.memory_space<vmem>>, %arg12: memref<1x256xf32, #tpu.memory_space<vmem>>, %arg13: memref<256x256xbf16, #tpu.memory_space<vmem>>, %arg14: memref<1x256xf32, #tpu.memory_space<vmem>>, %arg15: memref<32x256xbf16, #tpu.memory_space<vmem>>, %arg16: memref<1x32xf32, #tpu.memory_space<vmem>>, %arg17: memref<1x32xf32, #tpu.memory_space<vmem>>, %arg18: memref<1x32xf32, #tpu.memory_space<vmem>>, %arg19: memref<1x8x32xf32, #tpu.memory_space<vmem>>, %arg20: memref<1x4x8x8xf32, #tpu.memory_space<vmem>>) attributes {dimension_semantics = [#tpu.dimension_semantics<parallel>], iteration_bounds = array<i64: 2>, scalar_prefetch = 0 : i64, scratch_operands = 0 : i64, tpu.core_type = #tpu.core_type<tc>, window_params = [{transform_indices = @transform_0, window_bounds = array<i64: 1, 8, 32>}, {transform_indices = @transform_1, window_bounds = array<i64: 1, 8, 32>}, {pipeline_mode = #tpu.pipeline_mode<synchronous>, transform_indices = @transform_2, window_bounds = array<i64: 32, 32>}, {pipeline_mode = #tpu.pipeline_mode<synchronous>, transform_indices = @transform_3, window_bounds = array<i64: 1, 32>}, {pipeline_mode = #tpu.pipeline_mode<synchronous>, transform_indices = @transform_4, window_bounds = array<i64: 64, 32>}, {pipeline_mode = #tpu.pipeline_mode<synchronous>, transform_indices = @transform_5, window_bounds = array<i64: 1, 64>}, {pipeline_mode = #tpu.pipeline_mode<synchronous>, transform_indices = @transform_6, window_bounds = array<i64: 32, 32>}, {pipeline_mode = #tpu.pipeline_mode<synchronous>, transform_indices = @transform_7, window_bounds = array<i64: 1, 32>}, {pipeline_mode = #tpu.pipeline_mode<synchronous>, transform_indices = @transform_8, window_bounds = array<i64: 1, 32>}, {pipeline_mode = #tpu.pipeline_mode<synchronous>, transform_indices = @transform_9, window_bounds = array<i64: 1, 32>}, {pipeline_mode = #tpu.pipeline_mode<synchronous>, transform_indices = @transform_10, window_bounds = array<i64: 256, 32>}, {pipeline_mode = #tpu.pipeline_mode<synchronous>, transform_indices = @transform_11, window_bounds = array<i64: 1, 256>}, {pipeline_mode = #tpu.pipeline_mode<synchronous>, transform_indices = @transform_12, window_bounds = array<i64: 256, 256>}, {pipeline_mode = #tpu.pipeline_mode<synchronous>, transform_indices = @transform_13, window_bounds = array<i64: 1, 256>}, {pipeline_mode = #tpu.pipeline_mode<synchronous>, transform_indices = @transform_14, window_bounds = array<i64: 32, 256>}, {pipeline_mode = #tpu.pipeline_mode<synchronous>, transform_indices = @transform_15, window_bounds = array<i64: 1, 32>}, {pipeline_mode = #tpu.pipeline_mode<synchronous>, transform_indices = @transform_16, window_bounds = array<i64: 1, 32>}, {pipeline_mode = #tpu.pipeline_mode<synchronous>, transform_indices = @transform_17, window_bounds = array<i64: 1, 32>}, {transform_indices = @transform_18, window_bounds = array<i64: 1, 8, 32>}, {transform_indices = @transform_19, window_bounds = array<i64: 1, 4, 8, 8>}]} {
    %c0 = arith.constant 0 : index
    %c0_0 = arith.constant 0 : index
    %c0_1 = arith.constant 0 : index
    %0 = vector.load %arg1[%c0, %c0_0, %c0_1] : memref<1x8x32xf32, #tpu.memory_space<vmem>>, vector<1x8x32xf32>
    %1 = vector.shape_cast %0 : vector<1x8x32xf32> to vector<8x32xf32>
    %c0_2 = arith.constant 0 : index
    %c0_3 = arith.constant 0 : index
    %c0_4 = arith.constant 0 : index
    %2 = vector.load %arg2[%c0_2, %c0_3, %c0_4] : memref<1x8x32xf32, #tpu.memory_space<vmem>>, vector<1x8x32xf32>
    %3 = vector.shape_cast %2 : vector<1x8x32xf32> to vector<8x32xf32>
    %4 = arith.truncf %1 : vector<8x32xf32> to vector<8x32xbf16>
    %c0_5 = arith.constant 0 : index
    %c0_6 = arith.constant 0 : index
    %5 = vector.load %arg3[%c0_5, %c0_6] : memref<32x32xbf16, #tpu.memory_space<vmem>>, vector<32x32xbf16>
    %cst = arith.constant dense<0.000000e+00> : vector<8x32xf32>
    %6 = tpu.matmul %4, %5, %cst {dimension_numbers = #tpu.dot_dimension_numbers<[1], [1], [0], [0], [0, 0, 1, 0], [], []>} : vector<8x32xbf16>, vector<32x32xbf16>, vector<8x32xf32> -> vector<8x32xf32>
    %c0_7 = arith.constant 0 : index
    %c0_8 = arith.constant 0 : index
    %7 = vector.load %arg4[%c0_7, %c0_8] : memref<1x32xf32, #tpu.memory_space<vmem>>, vector<1x32xf32>
    %8 = vector.broadcast %7 : vector<1x32xf32> to vector<8x32xf32>
    %9 = arith.addf %6, %8 : vector<8x32xf32>
    %10 = arith.truncf %3 : vector<8x32xf32> to vector<8x32xbf16>
    %c0_9 = arith.constant 0 : index
    %c0_10 = arith.constant 0 : index
    %11 = vector.load %arg5[%c0_9, %c0_10] : memref<64x32xbf16, #tpu.memory_space<vmem>>, vector<64x32xbf16>
    %cst_11 = arith.constant dense<0.000000e+00> : vector<8x64xf32>
    %12 = tpu.matmul %10, %11, %cst_11 {dimension_numbers = #tpu.dot_dimension_numbers<[1], [1], [0], [0], [0, 0, 1, 0], [], []>} : vector<8x32xbf16>, vector<64x32xbf16>, vector<8x64xf32> -> vector<8x64xf32>
    %c0_12 = arith.constant 0 : index
    %c0_13 = arith.constant 0 : index
    %13 = vector.load %arg6[%c0_12, %c0_13] : memref<1x64xf32, #tpu.memory_space<vmem>>, vector<1x64xf32>
    %14 = vector.broadcast %13 : vector<1x64xf32> to vector<8x64xf32>
    %15 = arith.addf %12, %14 : vector<8x64xf32>
    %c0_14 = arith.constant 0 : index
    %c0_15 = arith.constant 0 : index
    %16 = vector.load %arg7[%c0_14, %c0_15] : memref<32x32xbf16, #tpu.memory_space<vmem>>, vector<32x32xbf16>
    %cst_16 = arith.constant 0.000000e+00 : f32
    %17 = vector.broadcast %cst_16 : f32 to vector<8x32xf32>
    %18 = vector.extract_strided_slice %9 {offsets = [0, 0], sizes = [8, 8], strides = [1, 1]} : vector<8x32xf32> to vector<8x8xf32>
    %19 = arith.truncf %18 : vector<8x8xf32> to vector<8x8xbf16>
    %20 = vector.extract_strided_slice %15 {offsets = [0, 0], sizes = [8, 8], strides = [1, 1]} : vector<8x64xf32> to vector<8x8xf32>
    %21 = arith.truncf %20 : vector<8x8xf32> to vector<8x8xbf16>
    %22 = vector.extract_strided_slice %15 {offsets = [0, 32], sizes = [8, 8], strides = [1, 1]} : vector<8x64xf32> to vector<8x8xf32>
    %23 = arith.truncf %22 : vector<8x8xf32> to vector<8x8xbf16>
    %cst_17 = arith.constant dense<0.000000e+00> : vector<8x8xf32>
    %24 = tpu.matmul %19, %21, %cst_17 {dimension_numbers = #tpu.dot_dimension_numbers<[1], [1], [0], [0], [0, 0, 1, 0], [], []>} : vector<8x8xbf16>, vector<8x8xbf16>, vector<8x8xf32> -> vector<8x8xf32>
    %cst_18 = arith.constant 0.353553385 : f32
    %25 = vector.broadcast %cst_18 : f32 to vector<8x8xf32>
    %26 = arith.mulf %24, %25 : vector<8x8xf32>
    %cst_19 = arith.constant dense<0xFF800000> : vector<8xf32>
    %27 = vector.multi_reduction <maximumf>, %26, %cst_19 [1] : vector<8x8xf32> to vector<8xf32>
    %28 = vector.shape_cast %27 : vector<8xf32> to vector<8x1xf32>
    %29 = vector.broadcast %28 : vector<8x1xf32> to vector<8x8xf32>
    %30 = arith.subf %26, %29 : vector<8x8xf32>
    %31 = math.exp %30 : vector<8x8xf32>
    %cst_20 = arith.constant dense<0.000000e+00> : vector<8xf32>
    %32 = vector.multi_reduction <add>, %31, %cst_20 [1] : vector<8x8xf32> to vector<8xf32>
    %33 = vector.shape_cast %32 : vector<8xf32> to vector<8x1xf32>
    %34 = tpu.reciprocal %33 {approx = true} : vector<8x1xf32> -> vector<8x1xf32>
    %35 = vector.broadcast %34 : vector<8x1xf32> to vector<8x8xf32>
    %36 = arith.mulf %31, %35 : vector<8x8xf32>
    %c0_21 = arith.constant 0 : index
    %c0_22 = arith.constant 0 : index
    %c0_23 = arith.constant 0 : index
    %c0_24 = arith.constant 0 : index
    %37 = vector.load %arg20[%c0_21, %c0_22, %c0_23, %c0_24] : memref<1x4x8x8xf32, #tpu.memory_space<vmem>>, vector<1x1x8x8xf32>
    %38 = vector.shape_cast %37 : vector<1x1x8x8xf32> to vector<8x8xf32>
    %39 = vector.shape_cast %36 : vector<8x8xf32> to vector<1x1x8x8xf32>
    tpu.vector_store %arg20[%c0_21, %c0_22, %c0_23, %c0_24], %39 {strides = array<i32>} : memref<1x4x8x8xf32, #tpu.memory_space<vmem>>, vector<1x1x8x8xf32>,
    %40 = arith.truncf %36 : vector<8x8xf32> to vector<8x8xbf16>
    %cst_25 = arith.constant dense<0.000000e+00> : vector<8x8xf32>
    %41 = tpu.matmul %40, %23, %cst_25 {dimension_numbers = #tpu.dot_dimension_numbers<[1], [0], [0], [1], [0, 0, 1, 1], [], []>} : vector<8x8xbf16>, vector<8x8xbf16>, vector<8x8xf32> -> vector<8x8xf32>
    %42 = arith.truncf %41 : vector<8x8xf32> to vector<8x8xbf16>
    %43 = vector.extract_strided_slice %16 {offsets = [0, 0], sizes = [32, 8], strides = [1, 1]} : vector<32x32xbf16> to vector<32x8xbf16>
    %cst_26 = arith.constant dense<0.000000e+00> : vector<8x32xf32>
    %44 = tpu.matmul %42, %43, %cst_26 {dimension_numbers = #tpu.dot_dimension_numbers<[1], [1], [0], [0], [0, 0, 1, 0], [], []>} : vector<8x8xbf16>, vector<32x8xbf16>, vector<8x32xf32> -> vector<8x32xf32>
    %45 = arith.addf %17, %44 : vector<8x32xf32>
    %46 = vector.extract_strided_slice %9 {offsets = [0, 8], sizes = [8, 8], strides = [1, 1]} : vector<8x32xf32> to vector<8x8xf32>
    %47 = arith.truncf %46 : vector<8x8xf32> to vector<8x8xbf16>
    %48 = vector.extract_strided_slice %15 {offsets = [0, 8], sizes = [8, 8], strides = [1, 1]} : vector<8x64xf32> to vector<8x8xf32>
    %49 = arith.truncf %48 : vector<8x8xf32> to vector<8x8xbf16>
    %50 = vector.extract_strided_slice %15 {offsets = [0, 40], sizes = [8, 8], strides = [1, 1]} : vector<8x64xf32> to vector<8x8xf32>
    %51 = arith.truncf %50 : vector<8x8xf32> to vector<8x8xbf16>
    %cst_27 = arith.constant dense<0.000000e+00> : vector<8x8xf32>
    %52 = tpu.matmul %47, %49, %cst_27 {dimension_numbers = #tpu.dot_dimension_numbers<[1], [1], [0], [0], [0, 0, 1, 0], [], []>} : vector<8x8xbf16>, vector<8x8xbf16>, vector<8x8xf32> -> vector<8x8xf32>
    %cst_28 = arith.constant 0.353553385 : f32
    %53 = vector.broadcast %cst_28 : f32 to vector<8x8xf32>
    %54 = arith.mulf %52, %53 : vector<8x8xf32>
    %cst_29 = arith.constant dense<0xFF800000> : vector<8xf32>
    %55 = vector.multi_reduction <maximumf>, %54, %cst_29 [1] : vector<8x8xf32> to vector<8xf32>
    %56 = vector.shape_cast %55 : vector<8xf32> to vector<8x1xf32>
    %57 = vector.broadcast %56 : vector<8x1xf32> to vector<8x8xf32>
    %58 = arith.subf %54, %57 : vector<8x8xf32>
    %59 = math.exp %58 : vector<8x8xf32>
    %cst_30 = arith.constant dense<0.000000e+00> : vector<8xf32>
    %60 = vector.multi_reduction <add>, %59, %cst_30 [1] : vector<8x8xf32> to vector<8xf32>
    %61 = vector.shape_cast %60 : vector<8xf32> to vector<8x1xf32>
    %62 = tpu.reciprocal %61 {approx = true} : vector<8x1xf32> -> vector<8x1xf32>
    %63 = vector.broadcast %62 : vector<8x1xf32> to vector<8x8xf32>
    %64 = arith.mulf %59, %63 : vector<8x8xf32>
    %c0_31 = arith.constant 0 : index
    %c1 = arith.constant 1 : index
    %c0_32 = arith.constant 0 : index
    %c0_33 = arith.constant 0 : index
    %65 = vector.load %arg20[%c0_31, %c1, %c0_32, %c0_33] : memref<1x4x8x8xf32, #tpu.memory_space<vmem>>, vector<1x1x8x8xf32>
    %66 = vector.shape_cast %65 : vector<1x1x8x8xf32> to vector<8x8xf32>
    %67 = vector.shape_cast %64 : vector<8x8xf32> to vector<1x1x8x8xf32>
    tpu.vector_store %arg20[%c0_31, %c1, %c0_32, %c0_33], %67 {strides = array<i32>} : memref<1x4x8x8xf32, #tpu.memory_space<vmem>>, vector<1x1x8x8xf32>,
    %68 = arith.truncf %64 : vector<8x8xf32> to vector<8x8xbf16>
    %cst_34 = arith.constant dense<0.000000e+00> : vector<8x8xf32>
    %69 = tpu.matmul %68, %51, %cst_34 {dimension_numbers = #tpu.dot_dimension_numbers<[1], [0], [0], [1], [0, 0, 1, 1], [], []>} : vector<8x8xbf16>, vector<8x8xbf16>, vector<8x8xf32> -> vector<8x8xf32>
    %70 = arith.truncf %69 : vector<8x8xf32> to vector<8x8xbf16>
    %71 = vector.extract_strided_slice %16 {offsets = [0, 8], sizes = [32, 8], strides = [1, 1]} : vector<32x32xbf16> to vector<32x8xbf16>
    %cst_35 = arith.constant dense<0.000000e+00> : vector<8x32xf32>
    %72 = tpu.matmul %70, %71, %cst_35 {dimension_numbers = #tpu.dot_dimension_numbers<[1], [1], [0], [0], [0, 0, 1, 0], [], []>} : vector<8x8xbf16>, vector<32x8xbf16>, vector<8x32xf32> -> vector<8x32xf32>
    %73 = arith.addf %45, %72 : vector<8x32xf32>
    %74 = vector.extract_strided_slice %9 {offsets = [0, 16], sizes = [8, 8], strides = [1, 1]} : vector<8x32xf32> to vector<8x8xf32>
    %75 = arith.truncf %74 : vector<8x8xf32> to vector<8x8xbf16>
    %76 = vector.extract_strided_slice %15 {offsets = [0, 16], sizes = [8, 8], strides = [1, 1]} : vector<8x64xf32> to vector<8x8xf32>
    %77 = arith.truncf %76 : vector<8x8xf32> to vector<8x8xbf16>
    %78 = vector.extract_strided_slice %15 {offsets = [0, 48], sizes = [8, 8], strides = [1, 1]} : vector<8x64xf32> to vector<8x8xf32>
    %79 = arith.truncf %78 : vector<8x8xf32> to vector<8x8xbf16>
    %cst_36 = arith.constant dense<0.000000e+00> : vector<8x8xf32>
    %80 = tpu.matmul %75, %77, %cst_36 {dimension_numbers = #tpu.dot_dimension_numbers<[1], [1], [0], [0], [0, 0, 1, 0], [], []>} : vector<8x8xbf16>, vector<8x8xbf16>, vector<8x8xf32> -> vector<8x8xf32>
    %cst_37 = arith.constant 0.353553385 : f32
    %81 = vector.broadcast %cst_37 : f32 to vector<8x8xf32>
    %82 = arith.mulf %80, %81 : vector<8x8xf32>
    %cst_38 = arith.constant dense<0xFF800000> : vector<8xf32>
    %83 = vector.multi_reduction <maximumf>, %82, %cst_38 [1] : vector<8x8xf32> to vector<8xf32>
    %84 = vector.shape_cast %83 : vector<8xf32> to vector<8x1xf32>
    %85 = vector.broadcast %84 : vector<8x1xf32> to vector<8x8xf32>
    %86 = arith.subf %82, %85 : vector<8x8xf32>
    %87 = math.exp %86 : vector<8x8xf32>
    %cst_39 = arith.constant dense<0.000000e+00> : vector<8xf32>
    %88 = vector.multi_reduction <add>, %87, %cst_39 [1] : vector<8x8xf32> to vector<8xf32>
    %89 = vector.shape_cast %88 : vector<8xf32> to vector<8x1xf32>
    %90 = tpu.reciprocal %89 {approx = true} : vector<8x1xf32> -> vector<8x1xf32>
    %91 = vector.broadcast %90 : vector<8x1xf32> to vector<8x8xf32>
    %92 = arith.mulf %87, %91 : vector<8x8xf32>
    %c0_40 = arith.constant 0 : index
    %c2 = arith.constant 2 : index
    %c0_41 = arith.constant 0 : index
    %c0_42 = arith.constant 0 : index
    %93 = vector.load %arg20[%c0_40, %c2, %c0_41, %c0_42] : memref<1x4x8x8xf32, #tpu.memory_space<vmem>>, vector<1x1x8x8xf32>
    %94 = vector.shape_cast %93 : vector<1x1x8x8xf32> to vector<8x8xf32>
    %95 = vector.shape_cast %92 : vector<8x8xf32> to vector<1x1x8x8xf32>
    tpu.vector_store %arg20[%c0_40, %c2, %c0_41, %c0_42], %95 {strides = array<i32>} : memref<1x4x8x8xf32, #tpu.memory_space<vmem>>, vector<1x1x8x8xf32>,
    %96 = arith.truncf %92 : vector<8x8xf32> to vector<8x8xbf16>
    %cst_43 = arith.constant dense<0.000000e+00> : vector<8x8xf32>
    %97 = tpu.matmul %96, %79, %cst_43 {dimension_numbers = #tpu.dot_dimension_numbers<[1], [0], [0], [1], [0, 0, 1, 1], [], []>} : vector<8x8xbf16>, vector<8x8xbf16>, vector<8x8xf32> -> vector<8x8xf32>
    %98 = arith.truncf %97 : vector<8x8xf32> to vector<8x8xbf16>
    %99 = vector.extract_strided_slice %16 {offsets = [0, 16], sizes = [32, 8], strides = [1, 1]} : vector<32x32xbf16> to vector<32x8xbf16>
    %cst_44 = arith.constant dense<0.000000e+00> : vector<8x32xf32>
    %100 = tpu.matmul %98, %99, %cst_44 {dimension_numbers = #tpu.dot_dimension_numbers<[1], [1], [0], [0], [0, 0, 1, 0], [], []>} : vector<8x8xbf16>, vector<32x8xbf16>, vector<8x32xf32> -> vector<8x32xf32>
    %101 = arith.addf %73, %100 : vector<8x32xf32>
    %102 = vector.extract_strided_slice %9 {offsets = [0, 24], sizes = [8, 8], strides = [1, 1]} : vector<8x32xf32> to vector<8x8xf32>
    %103 = arith.truncf %102 : vector<8x8xf32> to vector<8x8xbf16>
    %104 = vector.extract_strided_slice %15 {offsets = [0, 24], sizes = [8, 8], strides = [1, 1]} : vector<8x64xf32> to vector<8x8xf32>
    %105 = arith.truncf %104 : vector<8x8xf32> to vector<8x8xbf16>
    %106 = vector.extract_strided_slice %15 {offsets = [0, 56], sizes = [8, 8], strides = [1, 1]} : vector<8x64xf32> to vector<8x8xf32>
    %107 = arith.truncf %106 : vector<8x8xf32> to vector<8x8xbf16>
    %cst_45 = arith.constant dense<0.000000e+00> : vector<8x8xf32>
    %108 = tpu.matmul %103, %105, %cst_45 {dimension_numbers = #tpu.dot_dimension_numbers<[1], [1], [0], [0], [0, 0, 1, 0], [], []>} : vector<8x8xbf16>, vector<8x8xbf16>, vector<8x8xf32> -> vector<8x8xf32>
    %cst_46 = arith.constant 0.353553385 : f32
    %109 = vector.broadcast %cst_46 : f32 to vector<8x8xf32>
    %110 = arith.mulf %108, %109 : vector<8x8xf32>
    %cst_47 = arith.constant dense<0xFF800000> : vector<8xf32>
    %111 = vector.multi_reduction <maximumf>, %110, %cst_47 [1] : vector<8x8xf32> to vector<8xf32>
    %112 = vector.shape_cast %111 : vector<8xf32> to vector<8x1xf32>
    %113 = vector.broadcast %112 : vector<8x1xf32> to vector<8x8xf32>
    %114 = arith.subf %110, %113 : vector<8x8xf32>
    %115 = math.exp %114 : vector<8x8xf32>
    %cst_48 = arith.constant dense<0.000000e+00> : vector<8xf32>
    %116 = vector.multi_reduction <add>, %115, %cst_48 [1] : vector<8x8xf32> to vector<8xf32>
    %117 = vector.shape_cast %116 : vector<8xf32> to vector<8x1xf32>
    %118 = tpu.reciprocal %117 {approx = true} : vector<8x1xf32> -> vector<8x1xf32>
    %119 = vector.broadcast %118 : vector<8x1xf32> to vector<8x8xf32>
    %120 = arith.mulf %115, %119 : vector<8x8xf32>
    %c0_49 = arith.constant 0 : index
    %c3 = arith.constant 3 : index
    %c0_50 = arith.constant 0 : index
    %c0_51 = arith.constant 0 : index
    %121 = vector.load %arg20[%c0_49, %c3, %c0_50, %c0_51] : memref<1x4x8x8xf32, #tpu.memory_space<vmem>>, vector<1x1x8x8xf32>
    %122 = vector.shape_cast %121 : vector<1x1x8x8xf32> to vector<8x8xf32>
    %123 = vector.shape_cast %120 : vector<8x8xf32> to vector<1x1x8x8xf32>
    tpu.vector_store %arg20[%c0_49, %c3, %c0_50, %c0_51], %123 {strides = array<i32>} : memref<1x4x8x8xf32, #tpu.memory_space<vmem>>, vector<1x1x8x8xf32>,
    %124 = arith.truncf %120 : vector<8x8xf32> to vector<8x8xbf16>
    %cst_52 = arith.constant dense<0.000000e+00> : vector<8x8xf32>
    %125 = tpu.matmul %124, %107, %cst_52 {dimension_numbers = #tpu.dot_dimension_numbers<[1], [0], [0], [1], [0, 0, 1, 1], [], []>} : vector<8x8xbf16>, vector<8x8xbf16>, vector<8x8xf32> -> vector<8x8xf32>
    %126 = arith.truncf %125 : vector<8x8xf32> to vector<8x8xbf16>
    %127 = vector.extract_strided_slice %16 {offsets = [0, 24], sizes = [32, 8], strides = [1, 1]} : vector<32x32xbf16> to vector<32x8xbf16>
    %cst_53 = arith.constant dense<0.000000e+00> : vector<8x32xf32>
    %128 = tpu.matmul %126, %127, %cst_53 {dimension_numbers = #tpu.dot_dimension_numbers<[1], [1], [0], [0], [0, 0, 1, 0], [], []>} : vector<8x8xbf16>, vector<32x8xbf16>, vector<8x32xf32> -> vector<8x32xf32>
    %129 = arith.addf %101, %128 : vector<8x32xf32>
    %c0_54 = arith.constant 0 : index
    %c0_55 = arith.constant 0 : index
    %130 = vector.load %arg8[%c0_54, %c0_55] : memref<1x32xf32, #tpu.memory_space<vmem>>, vector<1x32xf32>
    %131 = vector.broadcast %130 : vector<1x32xf32> to vector<8x32xf32>
    %132 = arith.addf %129, %131 : vector<8x32xf32>
    %c0_56 = arith.constant 0 : index
    %c0_57 = arith.constant 0 : index
    %133 = vector.load %arg9[%c0_56, %c0_57] : memref<1x32xf32, #tpu.memory_space<vmem>>, vector<1x32xf32>
    %c0_58 = arith.constant 0 : index
    %c0_59 = arith.constant 0 : index
    %134 = vector.load %arg10[%c0_58, %c0_59] : memref<1x32xf32, #tpu.memory_space<vmem>>, vector<1x32xf32>
    %cst_60 = arith.constant dense<0.000000e+00> : vector<8xf32>
    %135 = vector.multi_reduction <add>, %132, %cst_60 [1] : vector<8x32xf32> to vector<8xf32>
    %136 = vector.shape_cast %135 : vector<8xf32> to vector<8x1xf32>
    %cst_61 = arith.constant 3.200000e+01 : f32
    %137 = vector.broadcast %cst_61 : f32 to vector<8x1xf32>
    %138 = arith.divf %136, %137 : vector<8x1xf32>
    %139 = vector.broadcast %138 : vector<8x1xf32> to vector<8x32xf32>
    %140 = arith.subf %132, %139 : vector<8x32xf32>
    %141 = arith.mulf %140, %140 : vector<8x32xf32>
    %cst_62 = arith.constant dense<0.000000e+00> : vector<8xf32>
    %142 = vector.multi_reduction <add>, %141, %cst_62 [1] : vector<8x32xf32> to vector<8xf32>
    %143 = vector.shape_cast %142 : vector<8xf32> to vector<8x1xf32>
    %cst_63 = arith.constant 3.200000e+01 : f32
    %144 = vector.broadcast %cst_63 : f32 to vector<8x1xf32>
    %145 = arith.divf %143, %144 : vector<8x1xf32>
    %cst_64 = arith.constant 9.99999997E-7 : f32
    %146 = vector.broadcast %cst_64 : f32 to vector<8x1xf32>
    %147 = arith.addf %145, %146 : vector<8x1xf32>
    %148 = math.rsqrt %147 : vector<8x1xf32>
    %149 = vector.broadcast %148 : vector<8x1xf32> to vector<8x32xf32>
    %150 = arith.mulf %140, %149 : vector<8x32xf32>
    %151 = vector.broadcast %133 : vector<1x32xf32> to vector<8x32xf32>
    %152 = arith.mulf %150, %151 : vector<8x32xf32>
    %153 = vector.broadcast %134 : vector<1x32xf32> to vector<8x32xf32>
    %154 = arith.addf %152, %153 : vector<8x32xf32>
    %155 = arith.addf %154, %1 : vector<8x32xf32>
    %156 = arith.truncf %155 : vector<8x32xf32> to vector<8x32xbf16>
    %c0_65 = arith.constant 0 : index
    %c0_66 = arith.constant 0 : index
    %157 = vector.load %arg11[%c0_65, %c0_66] : memref<256x32xbf16, #tpu.memory_space<vmem>>, vector<256x32xbf16>
    %cst_67 = arith.constant dense<0.000000e+00> : vector<8x256xf32>
    %158 = tpu.matmul %156, %157, %cst_67 {dimension_numbers = #tpu.dot_dimension_numbers<[1], [1], [0], [0], [0, 0, 1, 0], [], []>} : vector<8x32xbf16>, vector<256x32xbf16>, vector<8x256xf32> -> vector<8x256xf32>
    %c0_68 = arith.constant 0 : index
    %c0_69 = arith.constant 0 : index
    %159 = vector.load %arg12[%c0_68, %c0_69] : memref<1x256xf32, #tpu.memory_space<vmem>>, vector<1x256xf32>
    %160 = vector.broadcast %159 : vector<1x256xf32> to vector<8x256xf32>
    %161 = arith.addf %158, %160 : vector<8x256xf32>
    %cst_70 = arith.constant 5.000000e-01 : f32
    %162 = vector.broadcast %cst_70 : f32 to vector<8x256xf32>
    %163 = arith.mulf %162, %161 : vector<8x256xf32>
    %cst_71 = arith.constant 0.707106769 : f32
    %164 = vector.broadcast %cst_71 : f32 to vector<8x256xf32>
    %165 = arith.mulf %161, %164 : vector<8x256xf32>
    %cst_72 = arith.constant 0.000000e+00 : f32
    %166 = vector.broadcast %cst_72 : f32 to vector<8x256xf32>
    %167 = arith.cmpf oge, %165, %166 : vector<8x256xf32>
    %cst_73 = arith.constant 1.000000e+00 : f32
    %cst_74 = arith.constant -1.000000e+00 : f32
    %168 = vector.broadcast %cst_73 : f32 to vector<8x256xf32>
    %169 = vector.broadcast %cst_74 : f32 to vector<8x256xf32>
    %170 = arith.select %167, %168, %169 : vector<8x256xi1>, vector<8x256xf32>
    %171 = math.absf %165 : vector<8x256xf32>
    %cst_75 = arith.constant 0.327591091 : f32
    %172 = vector.broadcast %cst_75 : f32 to vector<8x256xf32>
    %173 = arith.mulf %172, %171 : vector<8x256xf32>
    %cst_76 = arith.constant 1.000000e+00 : f32
    %174 = vector.broadcast %cst_76 : f32 to vector<8x256xf32>
    %175 = arith.addf %174, %173 : vector<8x256xf32>
    %cst_77 = arith.constant 1.000000e+00 : f32
    %176 = vector.broadcast %cst_77 : f32 to vector<8x256xf32>
    %177 = arith.divf %176, %175 : vector<8x256xf32>
    %cst_78 = arith.constant 1.06140542 : f32
    %178 = vector.broadcast %cst_78 : f32 to vector<8x256xf32>
    %179 = arith.mulf %178, %177 : vector<8x256xf32>
    %cst_79 = arith.constant -1.45315206 : f32
    %180 = vector.broadcast %cst_79 : f32 to vector<8x256xf32>
    %181 = arith.addf %179, %180 : vector<8x256xf32>
    %182 = arith.mulf %181, %177 : vector<8x256xf32>
    %cst_80 = arith.constant 1.42141378 : f32
    %183 = vector.broadcast %cst_80 : f32 to vector<8x256xf32>
    %184 = arith.addf %182, %183 : vector<8x256xf32>
    %185 = arith.mulf %184, %177 : vector<8x256xf32>
    %cst_81 = arith.constant -0.284496725 : f32
    %186 = vector.broadcast %cst_81 : f32 to vector<8x256xf32>
    %187 = arith.addf %185, %186 : vector<8x256xf32>
    %188 = arith.mulf %187, %177 : vector<8x256xf32>
    %cst_82 = arith.constant 0.254829586 : f32
    %189 = vector.broadcast %cst_82 : f32 to vector<8x256xf32>
    %190 = arith.addf %188, %189 : vector<8x256xf32>
    %191 = arith.mulf %190, %177 : vector<8x256xf32>
    %cst_83 = arith.constant 0.000000e+00 : f32
    %192 = vector.broadcast %cst_83 : f32 to vector<8x256xf32>
    %193 = arith.subf %192, %171 : vector<8x256xf32>
    %194 = arith.mulf %193, %171 : vector<8x256xf32>
    %195 = math.exp %194 : vector<8x256xf32>
    %196 = arith.mulf %191, %195 : vector<8x256xf32>
    %cst_84 = arith.constant 1.000000e+00 : f32
    %197 = vector.broadcast %cst_84 : f32 to vector<8x256xf32>
    %198 = arith.subf %197, %196 : vector<8x256xf32>
    %199 = arith.mulf %170, %198 : vector<8x256xf32>
    %cst_85 = arith.constant 1.000000e+00 : f32
    %200 = vector.broadcast %cst_85 : f32 to vector<8x256xf32>
    %201 = arith.addf %200, %199 : vector<8x256xf32>
    %202 = arith.mulf %163, %201 : vector<8x256xf32>
    %203 = arith.truncf %202 : vector<8x256xf32> to vector<8x256xbf16>
    %c0_86 = arith.constant 0 : index
    %c0_87 = arith.constant 0 : index
    %204 = vector.load %arg13[%c0_86, %c0_87] : memref<256x256xbf16, #tpu.memory_space<vmem>>, vector<256x256xbf16>
    %cst_88 = arith.constant dense<0.000000e+00> : vector<8x256xf32>
    %205 = tpu.matmul %203, %204, %cst_88 {dimension_numbers = #tpu.dot_dimension_numbers<[1], [1], [0], [0], [0, 0, 1, 0], [], []>} : vector<8x256xbf16>, vector<256x256xbf16>, vector<8x256xf32> -> vector<8x256xf32>
    %c0_89 = arith.constant 0 : index
    %c0_90 = arith.constant 0 : index
    %206 = vector.load %arg14[%c0_89, %c0_90] : memref<1x256xf32, #tpu.memory_space<vmem>>, vector<1x256xf32>
    %207 = vector.broadcast %206 : vector<1x256xf32> to vector<8x256xf32>
    %208 = arith.addf %205, %207 : vector<8x256xf32>
    %cst_91 = arith.constant 5.000000e-01 : f32
    %209 = vector.broadcast %cst_91 : f32 to vector<8x256xf32>
    %210 = arith.mulf %209, %208 : vector<8x256xf32>
    %cst_92 = arith.constant 0.707106769 : f32
    %211 = vector.broadcast %cst_92 : f32 to vector<8x256xf32>
    %212 = arith.mulf %208, %211 : vector<8x256xf32>
    %cst_93 = arith.constant 0.000000e+00 : f32
    %213 = vector.broadcast %cst_93 : f32 to vector<8x256xf32>
    %214 = arith.cmpf oge, %212, %213 : vector<8x256xf32>
    %cst_94 = arith.constant 1.000000e+00 : f32
    %cst_95 = arith.constant -1.000000e+00 : f32
    %215 = vector.broadcast %cst_94 : f32 to vector<8x256xf32>
    %216 = vector.broadcast %cst_95 : f32 to vector<8x256xf32>
    %217 = arith.select %214, %215, %216 : vector<8x256xi1>, vector<8x256xf32>
    %218 = math.absf %212 : vector<8x256xf32>
    %cst_96 = arith.constant 0.327591091 : f32
    %219 = vector.broadcast %cst_96 : f32 to vector<8x256xf32>
    %220 = arith.mulf %219, %218 : vector<8x256xf32>
    %cst_97 = arith.constant 1.000000e+00 : f32
    %221 = vector.broadcast %cst_97 : f32 to vector<8x256xf32>
    %222 = arith.addf %221, %220 : vector<8x256xf32>
    %cst_98 = arith.constant 1.000000e+00 : f32
    %223 = vector.broadcast %cst_98 : f32 to vector<8x256xf32>
    %224 = arith.divf %223, %222 : vector<8x256xf32>
    %cst_99 = arith.constant 1.06140542 : f32
    %225 = vector.broadcast %cst_99 : f32 to vector<8x256xf32>
    %226 = arith.mulf %225, %224 : vector<8x256xf32>
    %cst_100 = arith.constant -1.45315206 : f32
    %227 = vector.broadcast %cst_100 : f32 to vector<8x256xf32>
    %228 = arith.addf %226, %227 : vector<8x256xf32>
    %229 = arith.mulf %228, %224 : vector<8x256xf32>
    %cst_101 = arith.constant 1.42141378 : f32
    %230 = vector.broadcast %cst_101 : f32 to vector<8x256xf32>
    %231 = arith.addf %229, %230 : vector<8x256xf32>
    %232 = arith.mulf %231, %224 : vector<8x256xf32>
    %cst_102 = arith.constant -0.284496725 : f32
    %233 = vector.broadcast %cst_102 : f32 to vector<8x256xf32>
    %234 = arith.addf %232, %233 : vector<8x256xf32>
    %235 = arith.mulf %234, %224 : vector<8x256xf32>
    %cst_103 = arith.constant 0.254829586 : f32
    %236 = vector.broadcast %cst_103 : f32 to vector<8x256xf32>
    %237 = arith.addf %235, %236 : vector<8x256xf32>
    %238 = arith.mulf %237, %224 : vector<8x256xf32>
    %cst_104 = arith.constant 0.000000e+00 : f32
    %239 = vector.broadcast %cst_104 : f32 to vector<8x256xf32>
    %240 = arith.subf %239, %218 : vector<8x256xf32>
    %241 = arith.mulf %240, %218 : vector<8x256xf32>
    %242 = math.exp %241 : vector<8x256xf32>
    %243 = arith.mulf %238, %242 : vector<8x256xf32>
    %cst_105 = arith.constant 1.000000e+00 : f32
    %244 = vector.broadcast %cst_105 : f32 to vector<8x256xf32>
    %245 = arith.subf %244, %243 : vector<8x256xf32>
    %246 = arith.mulf %217, %245 : vector<8x256xf32>
    %cst_106 = arith.constant 1.000000e+00 : f32
    %247 = vector.broadcast %cst_106 : f32 to vector<8x256xf32>
    %248 = arith.addf %247, %246 : vector<8x256xf32>
    %249 = arith.mulf %210, %248 : vector<8x256xf32>
    %250 = arith.truncf %249 : vector<8x256xf32> to vector<8x256xbf16>
    %c0_107 = arith.constant 0 : index
    %c0_108 = arith.constant 0 : index
    %251 = vector.load %arg15[%c0_107, %c0_108] : memref<32x256xbf16, #tpu.memory_space<vmem>>, vector<32x256xbf16>
    %cst_109 = arith.constant dense<0.000000e+00> : vector<8x32xf32>
    %252 = tpu.matmul %250, %251, %cst_109 {dimension_numbers = #tpu.dot_dimension_numbers<[1], [1], [0], [0], [0, 0, 1, 0], [], []>} : vector<8x256xbf16>, vector<32x256xbf16>, vector<8x32xf32> -> vector<8x32xf32>
    %c0_110 = arith.constant 0 : index
    %c0_111 = arith.constant 0 : index
    %253 = vector.load %arg16[%c0_110, %c0_111] : memref<1x32xf32, #tpu.memory_space<vmem>>, vector<1x32xf32>
    %254 = vector.broadcast %253 : vector<1x32xf32> to vector<8x32xf32>
    %255 = arith.addf %252, %254 : vector<8x32xf32>
    %c0_112 = arith.constant 0 : index
    %c0_113 = arith.constant 0 : index
    %256 = vector.load %arg17[%c0_112, %c0_113] : memref<1x32xf32, #tpu.memory_space<vmem>>, vector<1x32xf32>
    %c0_114 = arith.constant 0 : index
    %c0_115 = arith.constant 0 : index
    %257 = vector.load %arg18[%c0_114, %c0_115] : memref<1x32xf32, #tpu.memory_space<vmem>>, vector<1x32xf32>
    %cst_116 = arith.constant dense<0.000000e+00> : vector<8xf32>
    %258 = vector.multi_reduction <add>, %255, %cst_116 [1] : vector<8x32xf32> to vector<8xf32>
    %259 = vector.shape_cast %258 : vector<8xf32> to vector<8x1xf32>
    %cst_117 = arith.constant 3.200000e+01 : f32
    %260 = vector.broadcast %cst_117 : f32 to vector<8x1xf32>
    %261 = arith.divf %259, %260 : vector<8x1xf32>
    %262 = vector.broadcast %261 : vector<8x1xf32> to vector<8x32xf32>
    %263 = arith.subf %255, %262 : vector<8x32xf32>
    %264 = arith.mulf %263, %263 : vector<8x32xf32>
    %cst_118 = arith.constant dense<0.000000e+00> : vector<8xf32>
    %265 = vector.multi_reduction <add>, %264, %cst_118 [1] : vector<8x32xf32> to vector<8xf32>
    %266 = vector.shape_cast %265 : vector<8xf32> to vector<8x1xf32>
    %cst_119 = arith.constant 3.200000e+01 : f32
    %267 = vector.broadcast %cst_119 : f32 to vector<8x1xf32>
    %268 = arith.divf %266, %267 : vector<8x1xf32>
    %cst_120 = arith.constant 9.99999997E-7 : f32
    %269 = vector.broadcast %cst_120 : f32 to vector<8x1xf32>
    %270 = arith.addf %268, %269 : vector<8x1xf32>
    %271 = math.rsqrt %270 : vector<8x1xf32>
    %272 = vector.broadcast %271 : vector<8x1xf32> to vector<8x32xf32>
    %273 = arith.mulf %263, %272 : vector<8x32xf32>
    %274 = vector.broadcast %256 : vector<1x32xf32> to vector<8x32xf32>
    %275 = arith.mulf %273, %274 : vector<8x32xf32>
    %276 = vector.broadcast %257 : vector<1x32xf32> to vector<8x32xf32>
    %277 = arith.addf %275, %276 : vector<8x32xf32>
    %278 = arith.addf %277, %155 : vector<8x32xf32>
    %c0_121 = arith.constant 0 : index
    %c0_122 = arith.constant 0 : index
    %c0_123 = arith.constant 0 : index
    %279 = vector.load %arg19[%c0_121, %c0_122, %c0_123] : memref<1x8x32xf32, #tpu.memory_space<vmem>>, vector<1x8x32xf32>
    %280 = vector.shape_cast %279 : vector<1x8x32xf32> to vector<8x32xf32>
    %281 = vector.shape_cast %278 : vector<8x32xf32> to vector<1x8x32xf32>
    tpu.vector_store %arg19[%c0_121, %c0_122, %c0_123], %281 {strides = array<i32>} : memref<1x8x32xf32, #tpu.memory_space<vmem>>, vector<1x8x32xf32>,
    return
  }
  func.func @transform_0(%arg0: i32) -> (i32, i32, i32) {
    %c0_i32 = arith.constant 0 : i32
    %c0_i32_0 = arith.constant 0 : i32
    %c0_i32_1 = arith.constant 0 : i32
    return %arg0, %c0_i32, %c0_i32_0 : i32, i32, i32
  }
  func.func @transform_1(%arg0: i32) -> (i32, i32, i32) {
    %c0_i32 = arith.constant 0 : i32
    %c0_i32_0 = arith.constant 0 : i32
    %c0_i32_1 = arith.constant 0 : i32
    return %arg0, %c0_i32, %c0_i32_0 : i32, i32, i32
  }
  func.func @transform_2(%arg0: i32) -> (i32, i32) {
    %c0_i32 = arith.constant 0 : i32
    %c0_i32_0 = arith.constant 0 : i32
    %c0_i32_1 = arith.constant 0 : i32
    return %c0_i32, %c0_i32_0 : i32, i32
  }
  func.func @transform_3(%arg0: i32) -> (i32, i32) {
    %c0_i32 = arith.constant 0 : i32
    %c0_i32_0 = arith.constant 0 : i32
    %c0_i32_1 = arith.constant 0 : i32
    return %c0_i32, %c0_i32_0 : i32, i32
  }
  func.func @transform_4(%arg0: i32) -> (i32, i32) {
    %c0_i32 = arith.constant 0 : i32
    %c0_i32_0 = arith.constant 0 : i32
    %c0_i32_1 = arith.constant 0 : i32
    return %c0_i32, %c0_i32_0 : i32, i32
  }
  func.func @transform_5(%arg0: i32) -> (i32, i32) {
    %c0_i32 = arith.constant 0 : i32
    %c0_i32_0 = arith.constant 0 : i32
    %c0_i32_1 = arith.constant 0 : i32
    return %c0_i32, %c0_i32_0 : i32, i32
  }
  func.func @transform_6(%arg0: i32) -> (i32, i32) {
    %c0_i32 = arith.constant 0 : i32
    %c0_i32_0 = arith.constant 0 : i32
    %c0_i32_1 = arith.constant 0 : i32
    return %c0_i32, %c0_i32_0 : i32, i32
  }
  func.func @transform_7(%arg0: i32) -> (i32, i32) {
    %c0_i32 = arith.constant 0 : i32
    %c0_i32_0 = arith.constant 0 : i32
    %c0_i32_1 = arith.constant 0 : i32
    return %c0_i32, %c0_i32_0 : i32, i32
  }
  func.func @transform_8(%arg0: i32) -> (i32, i32) {
    %c0_i32 = arith.constant 0 : i32
    %c0_i32_0 = arith.constant 0 : i32
    %c0_i32_1 = arith.constant 0 : i32
    return %c0_i32, %c0_i32_0 : i32, i32
  }
  func.func @transform_9(%arg0: i32) -> (i32, i32) {
    %c0_i32 = arith.constant 0 : i32
    %c0_i32_0 = arith.constant 0 : i32
    %c0_i32_1 = arith.constant 0 : i32
    return %c0_i32, %c0_i32_0 : i32, i32
  }
  func.func @transform_10(%arg0: i32) -> (i32, i32) {
    %c0_i32 = arith.constant 0 : i32
    %c0_i32_0 = arith.constant 0 : i32
    %c0_i32_1 = arith.constant 0 : i32
    return %c0_i32, %c0_i32_0 : i32, i32
  }
  func.func @transform_11(%arg0: i32) -> (i32, i32) {
    %c0_i32 = arith.constant 0 : i32
    %c0_i32_0 = arith.constant 0 : i32
    %c0_i32_1 = arith.constant 0 : i32
    return %c0_i32, %c0_i32_0 : i32, i32
  }
  func.func @transform_12(%arg0: i32) -> (i32, i32) {
    %c0_i32 = arith.constant 0 : i32
    %c0_i32_0 = arith.constant 0 : i32
    %c0_i32_1 = arith.constant 0 : i32
    return %c0_i32, %c0_i32_0 : i32, i32
  }
  func.func @transform_13(%arg0: i32) -> (i32, i32) {
    %c0_i32 = arith.constant 0 : i32
    %c0_i32_0 = arith.constant 0 : i32
    %c0_i32_1 = arith.constant 0 : i32
    return %c0_i32, %c0_i32_0 : i32, i32
  }
  func.func @transform_14(%arg0: i32) -> (i32, i32) {
    %c0_i32 = arith.constant 0 : i32
    %c0_i32_0 = arith.constant 0 : i32
    %c0_i32_1 = arith.constant 0 : i32
    return %c0_i32, %c0_i32_0 : i32, i32
  }
  func.func @transform_15(%arg0: i32) -> (i32, i32) {
    %c0_i32 = arith.constant 0 : i32
    %c0_i32_0 = arith.constant 0 : i32
    %c0_i32_1 = arith.constant 0 : i32
    return %c0_i32, %c0_i32_0 : i32, i32
  }
  func.func @transform_16(%arg0: i32) -> (i32, i32) {
    %c0_i32 = arith.constant 0 : i32
    %c0_i32_0 = arith.constant 0 : i32
    %c0_i32_1 = arith.constant 0 : i32
    return %c0_i32, %c0_i32_0 : i32, i32
  }
  func.func @transform_17(%arg0: i32) -> (i32, i32) {
    %c0_i32 = arith.constant 0 : i32
    %c0_i32_0 = arith.constant 0 : i32
    %c0_i32_1 = arith.constant 0 : i32
    return %c0_i32, %c0_i32_0 : i32, i32
  }
  func.func @transform_18(%arg0: i32) -> (i32, i32, i32) {
    %c0_i32 = arith.constant 0 : i32
    %c0_i32_0 = arith.constant 0 : i32
    %c0_i32_1 = arith.constant 0 : i32
    return %arg0, %c0_i32, %c0_i32_0 : i32, i32, i32
  }
  func.func @transform_19(%arg0: i32) -> (i32, i32, i32, i32) {
    %c0_i32 = arith.constant 0 : i32
    %c0_i32_0 = arith.constant 0 : i32
    %c0_i32_1 = arith.constant 0 : i32
    %c0_i32_2 = arith.constant 0 : i32
    return %arg0, %c0_i32, %c0_i32_0, %c0_i32_1 : i32, i32, i32, i32
  }
}

</mosaic_0001>

<bundles_post_ra>
// kernel: tpu_custom_call.1
= control target key start
LH: loop header
LB: loop body
LE: loop exit
PB: predicated region body
PF: predicated region fallthrough
CT: control target
= control target key end

     0   :  { %s3500_s0 = inlined_call_operand.vmem [shape: f32[2,8,32], index: 0, kind: input, shape index: {}]   ;;  %s3501_s1 = inlined_call_operand.vmem [shape: f32[2,8,32], index: 1, kind: input, shape index: {}]   ;;  %s3502_s2 = inlined_call_operand.vmem [shape: bf16[32,32], index: 2, kind: input, shape index: {}]   ;;  %s3503_s3 = inlined_call_operand.vmem [shape: f32[1,32], index: 3, kind: input, shape index: {}]   ;;  %s3504_s4 = inlined_call_operand.vmem [shape: bf16[64,32], index: 4, kind: input, shape index: {}]   ;;  %s3505_s5 = inlined_call_operand.vmem [shape: f32[1,64], index: 5, kind: input, shape index: {}]   ;;  %s3506_s6 = inlined_call_operand.vmem [shape: bf16[32,32], index: 6, kind: input, shape index: {}]   ;;  %s3507_s7 = inlined_call_operand.vmem [shape: f32[1,32], index: 7, kind: input, shape index: {}]   ;;  %s3508_s8 = inlined_call_operand.vmem [shape: f32[1,32], index: 8, kind: input, shape index: {}]   ;;  %s3509_s9 = inlined_call_operand.vmem [shape: f32[1,32], index: 9, kind: input, shape index: {}]   ;;  %s3510_s10 = inlined_call_operand.vmem [shape: bf16[256,32], index: 10, kind: input, shape index: {}]   ;;  %s3511_s11 = inlined_call_operand.vmem [shape: f32[1,256], index: 11, kind: input, shape index: {}]   ;;  %s3512_s12 = inlined_call_operand.hbm [shape: bf16[256,256], index: 12, kind: input, shape index: {}]   ;;  %s3513_s13 = inlined_call_operand.vmem [shape: f32[1,256], index: 13, kind: input, shape index: {}]   ;;  %s3514_s14 = inlined_call_operand.vmem [shape: bf16[32,256], index: 14, kind: input, shape index: {}]   ;;  %s3515_s15 = inlined_call_operand.vmem [shape: f32[1,32], index: 15, kind: input, shape index: {}]   ;;  %s3516_s16 = inlined_call_operand.vmem [shape: f32[1,32], index: 16, kind: input, shape index: {}]   ;;  %s3517_s17 = inlined_call_operand.vmem [shape: f32[1,32], index: 17, kind: input, shape index: {}]   ;;  %s3518_s18 = inlined_call_operand.hbm [shape: f32[2,8,32], index: 18, kind: output, shape index: {0}]   ;;  %s3519_s19 = inlined_call_operand.hbm [shape: f32[2,4,8,8], index: 19, kind: output, shape index: {1}]  }
   0x1   :  { %3526 = sst [smem:[#allocation16_spill]] %s3500_s0 }
   0x2   :  { %3527 = sst [smem:[#allocation17_spill]] %s3501_s1 }
   0x3   :  { %3528 = sst [smem:[#allocation18_spill]] %s3502_s2 }
   0x4   :  { %3529 = sst [smem:[#allocation19_spill]] %s3503_s3 }
   0x5   :  { %3530 = sst [smem:[#allocation20_spill]] %s3504_s4 }
   0x6   :  { %3531 = sst [smem:[#allocation21_spill]] %s3512_s12 }
   0x7   :  { %25 = vsyncpa [#allocation3], 0 }
   0x8   :  { %26 = vsyncpa [#allocation4], 0 }
   0x9   :  { %28 = vsyncpa [#allocation4 + $0x1], 0 }
   0xa   :  { %29 = vsyncpa [#allocation7], 0 }
   0xb   :  { %31 = vsyncpa [#allocation7 + $0x1], 0  ;;  %s3041_s0 = smov 0   ;;  %s3043_s30 = smov 0  }
   0xc   :  { %s3045_s20 = smov 0   ;;  %s3047_s21 = smov 0  }
   0xd LB: > { %3532 = sst [smem:[#allocation11_spill]] %s2910_s0  ;;  %s3062_s1 = sadd.s32 4294967295, %s2922_s21   ;;  %s2922_s21 = sphi %s3047_s21, %s3550_s21   ;;  %s2918_s20 = sphi %s3045_s20, %s3552_s20   ;;  %s2914_s30 = sphi %s3043_s30, %s3554_s30   ;;  %s2910_s0 = sphi %s3041_s0, %s3553_s0  }
   0xe   : > { %3533 = sst [smem:[#allocation12_spill]] %s2918_s20  ;;  %s2353_s22 = sadd.s32 4294967294, %s2922_s21  }
   0xf   : > { %s3066_s2 = sadd.s32 1, %s2922_s21   ;;  %s432_s23 = sadd.s32 1, %s2918_s20 }
  0x10   : > { %3534 = sst [smem:[#allocation13_spill]] %s3066_s2  ;;  %s429_s24 = ssub.s32 %s2922_s21, %s3066_s2 }
  0x11   : > { %p442_p0 = scmp.ne.s32.totalorder %s2918_s20, %s2914_s30  ;;  %p430_p1 = scmp.eq.s32.totalorder %s429_s24, 0 }
  0x12   : > { %p443_p2 = scmp.eq.s32.totalorder %s3062_s1, 1  ;;  %p448_p3 = scmp.ne.s32.totalorder %s2914_s30, %s2910_s0 }
  0x13   : > { %p449_p4 = scmp.eq.s32.totalorder %s2353_s22, 1  ;;  %p2354_p7 = scmp.ge.s32.totalorder %s2922_s21, 1 }
  0x14   : > { %s3077_s25 = scalar_select %p430_p1, %s2918_s20, %s432_s23  }
  0x15   : > { %p3079_p5 = por %p443_p2, %p442_p0  ;;  %p3083_p6 = por %p449_p4, %p448_p3 }
  0x16   : > { %3535 = sst [smem:[#allocation14_spill]] %s3077_s25  ;;  %p482_p8 = scmp.lt.s32.totalorder %s2922_s21, 3 }
  0x17   : > { %s3537_s26 = scalar_select %p3083_p6, 1, 0 }
  0x18   : > { %p2638_p9 = scmp.eq.s32.totalorder %s3062_s1, 0  ;;  %p3090_p10 = pnand %p2354_p7, %p482_p8 }
  0x19   : > { %3538 = sst [smem:[#allocation15_spill]] %s3537_s26  ;;  %s2924_s28 = smov [#allocation2]  }
  0x1a   : > { %s524_s29 = sshll.u32 %s2924_s28, 4  ;;  %p2627_p11 = pneg %p3090_p10  ;;  %s525_s29 = int_to_ptr.vmem [resolvable:$true] %s524_s29 }
  0x1b   : > { %s2813_s22 = scalar_lea.vmem %s525_s29, 4096  ;;  %p2821_p3 = scmp.lt.s32.totalorder %s525_s29, %s525_s29 }
  0x1c   : > { %p2628_p12 = pnand %p2638_p9, %p2627_p11  ;;  %p2814_p0 = scmp.ne.s32.totalorder %s525_s29, %s2813_s22 }
  0x1d   : > { %p2822_p4 = scmp.lt.s32.totalorder %s2813_s22, %s2813_s22 }
  0x1e   : > { %p2804_p13 = pneg %p2628_p12 }
  0x1f   : > { %p2823_p6 = por %p2822_p4, %p2821_p3 }
  0x20   : > { %p2816_p1 = pnand %p2814_p0, %p2804_p13 }
  0x22   : > { %p2817_p2 = pneg %p2816_p1 }
  0x24   : > { %p2824_p7 = pnand %p2823_p6, %p2817_p2 }
  0x26   : > { %2827 = shalt.err (!%p2824_p7)
}
  0x27   : > { %s2925_s23 = smov 128   ;;  %s2926_s24 = smov 8  }
  0x28   : > { %s3540_s12 = sld [smem:[#allocation21_spill]] }
  0x2a   : > { %569 = sbr.rel (%p3090_p10) target bundleno = 3794 (0xed2), region = 92 }
  0x2e   : > { %2630 = dma.hbm_to_vmem [thread:$0]  (!%p2628_p12), %s3540_s12, 4096, %s525_s29, [#allocation3], %s2925_s23, %s2925_s23, %s2926_s24  }
  0x2f   : > { %2897 = dma.done.wait (%p2638_p9), [#allocation3], 4096  }
  0x30   : > { %2899 = vsyncadd (%p2638_p9), [#allocation3], 4294963200  ;;  %v2927_v0 = vmov 0.0   ;;  %vm2928_vm0 = vmmov 0   ;;  %p633_p6 = scmp.lt.s32.totalorder %s3062_s1, 1  ;;  %vm666_vm1 = vcmask 261120  }
  0x31   : > { %2511 = vmatprep.subr.bf16.mxu1 %v2927_v0  ;;  %2515 = vmatprep.mubr.msk.bf16.mxu1 %vm2928_vm0, %v2927_v0  ;;  %s3541_s28 = sld [smem:[#allocation18_spill]]  ;;  %v2367_v21 = vld [vmem:[%s3505_s5] ss:$0 sm:$0xff]  ;;  %vm813_vm2 = vcmask 64512   ;;  %s2929_s26 = smov 96   ;;  %vm880_vm3 = vcmask 1043456  }
  0x32   : > { %2531 = vmatprep.subr.bf16.mxu0 %v2927_v0  ;;  %2533 = vmatprep.mubr.msk.bf16.mxu0 %vm2928_vm0, %v2927_v0  ;;  %s3115_s20 = scalar_select %p633_p6, %s3062_s1, 1 }
  0x33   : > { %s3542_s4 = sld [smem:[#allocation20_spill]]  ;;  %s2930_s27 = smov 120  }
  0x34   : > { %s2361_s23 = sshll.u32 %s3115_s20, 3  ;;  %s3543_s0 = sld [smem:[#allocation16_spill]] }
  0x35   : > { %s3544_s24 = sld [smem:[#allocation17_spill]]  ;;  %s2931_s29 = smov 112  }
  0x36   : > { %s3545_s2 = sld [smem:[#allocation19_spill]]  ;;  %s3195_s22 = sand.u32 1, %s2914_s30  }
  0x37   : > { %v2688_v1 = vld [vmem:[%s3541_s28 + $0x8] sm:$0xff]   ;;  %v2689_v3 = vld [vmem:[%s3541_s28] sm:$0xff]   ;;  %s2932_s12 = smov 88  }
  0x38   : > { %v674_v2 = vsel %vm666_vm1, %v2688_v1, 0  ;;  %v671_v5 = vsel %vm666_vm1, %v2689_v3, 0 }
  0x39   : > { %2512 = vmatpush3.bf16.xpose.msra.mxu1 %v674_v2  ;;  %v2690_v4 = vld [vmem:[%s3542_s4 + $0x18] sm:$0xff]   ;;  %v2691_v9 = vld [vmem:[%s3542_s4 + $0x10] sm:$0xff]   ;;  %v2692_v11 = vld [vmem:[%s3542_s4 + $0x8] sm:$0xff]  }
  0x3a   : > { %2513 = vmatprep.subr.bf16.mxu1 %v2927_v0  ;;  %s636_s25 = scalar_lea.vmem %s3543_s0, %s2361_s23  ;;  %v765_v6 = vsel %vm666_vm1, %v2690_v4, 0  ;;  %v762_v10 = vsel %vm666_vm1, %v2691_v9, 0  ;;  %v759_v12 = vsel %vm666_vm1, %v2692_v11, 0  ;;  %v2693_v13 = vld [vmem:[%s3542_s4] sm:$0xff]  }
  0x3b   : > { %v3134_v7 = vld [vmem:[%s636_s25] sm:$0xff]  ;;  %s640_s25 = scalar_lea.vmem %s3544_s24, %s2361_s23  ;;  %v756_v14 = vsel %vm666_vm1, %v2693_v13, 0  ;;  %s2360_s24 = sshll.u32 %s3195_s22, 5 }
  0x3c   : > { %v644_v8 = vpack.c.bf16 %v3134_v7, %v3134_v7  ;;  %v643_v15 = vld [vmem:[%s640_s25] sm:$0xff]  ;;  %s3198_s25 = scalar_lea.vmem [#allocation6], %s2360_s24  ;;  %s2934_s24 = smov 104  }
  0x3d   : > { %v716_v16 = vpack.c.bf16 %v643_v15, %v643_v15  ;;  %v2363_v26 = vld [vmem:[%s3545_s2] ss:$0 sm:$0xff]  ;;  %s2235_s2 = sshll.u32 %s3198_s25, 4  ;;  %s2937_s23 = smov [#allocation6]   ;;  %s3427_s2 = int_to_ptr.vmem [resolvable:$true] %s2235_s2 }
  0x3e   : > { %s2828_s20 = scalar_lea.vmem %s3427_s2, 512  ;;  %s2832_s4 = sshll.u32 %s2937_s23, 4  ;;  %s2833_s4 = int_to_ptr.vmem [resolvable:$false] %s2832_s4 }
  0x3f   : > { %p2829_p8 = scmp.ne.s32.totalorder %s3427_s2, %s2828_s20  ;;  %p2835_p11 = scmp.lt.s32.totalorder %s3427_s2, %s2833_s4 }
  0x41   : > { %2514 = vmatpush3.bf16.xpose.msra.mxu1 %v671_v5  ;;  %p2830_p9 = pnand %p2829_p8, %p3079_p5 }
  0x42   : > { %2519 = vmatprep.subr.bf16.mxu1 %v2927_v0 }
  0x43   : > { %p2831_p10 = pneg %p2830_p9 }
  0x48   : > { %2516 = vmatmul.mubr.msk.bf16.vlgmr.msra.gmra.mxu1 %vm666_vm1, %v644_v8 }
  0x49   : > { %2520 = vmatpush3.bf16.xpose.msra.mxu1 %v765_v6  ;;  %2527 = vmatprep.mubr.msk.bf16.mxu1 %vm2928_vm0, %v2927_v0  ;;  %v3222_v6 = vld [vmem:[%s3506_s6] sm:$0xff]  }
  0x4a   : > { %2521 = vmatprep.subr.bf16.mxu1 %v2927_v0 }
  0x51   : > { %2522 = vmatpush3.bf16.xpose.msra.mxu1 %v762_v10 }
  0x52   : > { %2523 = vmatprep.subr.bf16.mxu1 %v2927_v0 }
  0x59   : > { %2524 = vmatpush3.bf16.xpose.msra.mxu1 %v759_v12 }
  0x5a   : > { %2525 = vmatprep.subr.bf16.mxu1 %v2927_v0 }
  0x61   : > { %2526 = vmatpush3.bf16.xpose.msra.mxu1 %v756_v14 }
  0x62   : > { %2549 = vmatprep.subr.bf16.mxu1 %v2927_v0 }
  0x68   : > { %2528 = vmatmul.mubr.msk.bf16.vlgmr.msra.gmra.mxu1 %vm666_vm1, %v716_v16 }
  0x69   : > { %2551 = vmatprep.mubr.msk.bf16.mxu1 %vm2928_vm0, %v2927_v0 }
 0x108   : > { %v710_v17 = vpop.f32.mrf.mxu1 }
 0x109   : > { %v711_v30 = vadd.f32 %v2363_v26, %v710_v17  ;;  %v3233_v17 = vld [vmem:[%s3506_s6 + $0x8] sm:$0xff]  }
 0x10a   : > { %v2517_v18 = vpop.f32.mrf.mxu1 }
 0x10b   : > { %v3178_v31 = vpack.c.bf16 %v711_v30, %v711_v30 }
 0x10c   : > { %v713_v19 = vpop.f32.mrf.mxu1 }
 0x10e   : > { %v2518_v20 = vpop.f32.mrf.mxu1 }
 0x128   : > { %v801_v22 = vpop.f32.mrf.mxu1 }
 0x129   : > { %v802_v23 = vadd.f32 %v2367_v21, %v801_v22 }
 0x12a   : > { %v2529_v24 = vpop.f32.mrf.mxu1 }
 0x12b   : > { %v3167_v25 = vpack.c.bf16 %v802_v23, %v802_v23 }
 0x12c   : > { %v804_v27 = vpop.f32.mrf.mxu1 }
 0x12d   : > { %875 = vrot.lane.b32.xlu1 %v3167_v25, %s2929_s26  ;;  %v818_v28 = vsel %vm813_vm2, %v3167_v25, 0  ;;  %s2933_s26 = smov 80  }
 0x12e   : > { %v2530_v29 = vpop.f32.mrf.mxu1  ;;  %2532 = vmatpush3.bf16.xpose.msra.mxu0 %v818_v28 }
 0x12f   : > { %2537 = vmatprep.subr.bf16.mxu0 %v2927_v0 }
 0x131   : > { %928 = vrot.lane.b32.xlu1 %v3167_v25, %s2930_s27 }
 0x135   : > { %1154 = vrot.lane.b32.xlu1 %v3167_v25, %s2931_s29  ;;  %2534 = vmatmul.mubr.msk.bf16.vlgmr.msra.gmra.mxu0 %vm813_vm2, %v3178_v31 }
 0x136   : > { %2539 = vmatprep.mubr.msk.bf16.mxu0 %vm2928_vm0, %v2927_v0 }
 0x139   : > { %1152 = vrot.lane.b32.xlu1 %v3178_v31, %s2931_s29 }
 0x19f   : > { %v876_v32 = vpop.permute.xlu1 %875 }
 0x1a0   : > { %v882_v33 = vsel %vm880_vm3, %v876_v32, 0 }
 0x1a1   : > { %2538 = vmatpush3.bf16.msra.mxu0 %v882_v33 }
 0x1a2   : > { %2543 = vmatprep.subr.bf16.mxu0 %v2927_v0 }
 0x1a3   : > { %v929_v48 = vpop.permute.xlu1 %928 }
 0x1a4   : > { %v934_v50 = vsel %vm813_vm2, %v929_v48, 0 }
 0x1a7   : > { %v1155_v51 = vpop.permute.xlu1 %1154 }
 0x1a8   : > { %v1160_v53 = vsel %vm813_vm2, %v1155_v51, 0 }
 0x1ab   : > { %v1153_v54 = vpop.permute.xlu1 %1152 }
 0x1f5   : > { %v854_v34 = vpop.f32.mrf.mxu0 }
 0x1f6   : > { %v860_v35 = vmul.f32 0.35355338, %v854_v34 }
 0x1f7   : > { %v2535_v36 = vpop.f32.mrf.mxu0 }
 0x1f8   : > { %v861_v37 = vsel %vm813_vm2, %v860_v35, -inf }
 0x1f9   : > { %862 = vmax.xlane.f32.xlu0 %v861_v37  ;;  %v857_v38 = vpop.f32.mrf.mxu0  ;;  %v1110_v37 = vsel %vm813_vm2, %v3233_v17, 0 }
 0x1fb   : > { %v2536_v39 = vpop.f32.mrf.mxu0 }
 0x282   : > { %v863_v40 = vpop.xlane.xlu0 %862 }
 0x283   : > { %v864_v41 = vsub.f32 %v860_v35, %v863_v40 }
 0x285   : > { %v865_v42 = vmul.f32 1.442695, %v864_v41  ;;  %v1107_v41 = vsel %vm813_vm2, %v3222_v6, 0 }
 0x287   : > { %2766 = vpow2.f32 %v865_v42 }
 0x294   : > { %v2767_v43 = vpop.eup %2766 }
 0x295   : > { %v867_v44 = vsel %vm813_vm2, %v2767_v43, 0.0 }
 0x296   : > { %868 = vadd.xlane.f32.xlu0 %v867_v44 }
 0x2ac   : > { %926 = vrot.lane.b32.xlu0 %v3178_v31, %s2930_s27 }
 0x31f   : > { %v869_v45 = vpop.xlane.xlu0 %868 }
 0x320   : > { %2768 = vrcp.f32 %v869_v45 }
 0x323   : > { %v927_v52 = vpop.permute.xlu0 %926 }
 0x32d   : > { %v2769_v46 = vpop.eup %2768 }
 0x32e   : > { %v871_v47 = vmul.f32 %v2769_v46, %v2767_v43 }
 0x330   : > { %v873_v49 = vpack.c.bf16 %v871_v47, %v871_v47  ;;  %872 = vst.msk [vmem:[%s3198_s25] sm:$0xff] %vm813_vm2, %v871_v47 }
 0x332   : > { %2540 = vmatmul.mubr.msk.bf16.vlgmr.msra.gmra.mxu0 %vm813_vm2, %v873_v49 }
 0x333   : > { %2544 = vmatpush3.bf16.xpose.msra.mxu0 %v934_v50  ;;  %2545 = vmatprep.mubr.msk.bf16.mxu0 %vm2928_vm0, %v2927_v0 }
 0x334   : > { %2571 = vmatprep.subr.bf16.mxu0 %v2927_v0 }
 0x33a   : > { %2546 = vmatmul.mubr.msk.bf16.vlgmr.msra.gmra.mxu0 %vm813_vm2, %v927_v52 }
 0x33b   : > { %2572 = vmatpush3.bf16.xpose.msra.mxu0 %v1160_v53  ;;  %2573 = vmatprep.mubr.msk.bf16.mxu0 %vm2928_vm0, %v2927_v0 }
 0x33c   : > { %2583 = vmatprep.subr.bf16.mxu0 %v2927_v0 }
 0x342   : > { %2574 = vmatmul.mubr.msk.bf16.vlgmr.msra.gmra.mxu0 %vm813_vm2, %v1153_v54 }
 0x343   : > { %2587 = vmatprep.mubr.msk.bf16.mxu0 %vm2928_vm0, %v2927_v0 }
 0x3f2   : > { %v3215_v55 = vpop.f32.mrf.mxu0 }
 0x3f3   : > { %v924_v43 = vpack.c.bf16 %v3215_v55, %v3215_v55 }
 0x3f4   : > { %v2541_v56 = vpop.f32.mrf.mxu0 }
 0x3f6   : > { %v921_v57 = vpop.f32.mrf.mxu0 }
 0x3f8   : > { %v2542_v58 = vpop.f32.mrf.mxu0 }
 0x3fa   : > { %v970_v59 = vpop.f32.mrf.mxu0 }
 0x3fb   : > { %v976_v60 = vmul.f32 0.35355338, %v970_v59 }
 0x3fc   : > { %v2547_v61 = vpop.f32.mrf.mxu0 }
 0x3fd   : > { %v977_v62 = vsel %vm813_vm2, %v976_v60, -inf }
 0x3fe   : > { %978 = vmax.xlane.f32.xlu1 %v977_v62  ;;  %v973_v63 = vpop.f32.mrf.mxu0 }
 0x400   : > { %v2548_v1 = vpop.f32.mrf.mxu0 }
 0x402   : > { %v1196_v2 = vpop.f32.mrf.mxu0 }
 0x403   : > { %v1202_v14 = vmul.f32 0.35355338, %v1196_v2 }
 0x404   : > { %v2575_v3 = vpop.f32.mrf.mxu0 }
 0x405   : > { %v1203_v16 = vsel %vm813_vm2, %v1202_v14, -inf }
 0x406   : > { %v1199_v4 = vpop.f32.mrf.mxu0 }
 0x408   : > { %v2576_v5 = vpop.f32.mrf.mxu0 }
 0x40f   : > { %991 = vrot.lane.b32.xlu1 %v3167_v25, %s2932_s12 }
 0x413   : > { %1050 = vrot.lane.b32.xlu1 %v3222_v6, %s2930_s27 }
 0x487   : > { %v979_v8 = vpop.xlane.xlu1 %978 }
 0x488   : > { %v980_v9 = vsub.f32 %v976_v60, %v979_v8 }
 0x48a   : > { %v981_v10 = vmul.f32 1.442695, %v980_v9 }
 0x48b   : > { %v992_v11 = vpop.permute.xlu1 %991 }
 0x48c   : > { %2770 = vpow2.f32 %v981_v10  ;;  %v997_v12 = vsel %vm880_vm3, %v992_v11, 0 }
 0x48d   : > { %2550 = vmatpush3.bf16.msra.mxu1 %v997_v12 }
 0x48e   : > { %2555 = vmatprep.subr.bf16.mxu1 %v2927_v0 }
 0x48f   : > { %v1051_v30 = vpop.permute.xlu1 %1050 }
 0x499   : > { %v2771_v13 = vpop.eup %2770 }
 0x49a   : > { %v983_v15 = vsel %vm813_vm2, %v2771_v13, 0.0 }
 0x49b   : > { %984 = vadd.xlane.f32.xlu0 %v983_v15 }
 0x49f   : > { %1204 = vmax.xlane.f32.xlu0 %v1203_v16 }
 0x4b5   : > { %1052 = vrot.lane.b32.xlu0 %v3233_v17, %s2930_s27  ;;  %s2935_s27 = smov 72  }
 0x4b9   : > { %1217 = vrot.lane.b32.xlu0 %v3167_v25, %s2933_s26  ;;  %s2456_s26 = sshll.u32 %s3062_s1, 9 }
 0x4bd   : > { %1322 = vrot.lane.b32.xlu0 %v3167_v25, %s2934_s24 }
 0x4c1   : > { %1320 = vrot.lane.b32.xlu0 %v3178_v31, %s2934_s24  ;;  %v1058_v31 = vsel %vm813_vm2, %v1051_v30, 0 }
 0x524   : > { %v985_v18 = vpop.xlane.xlu0 %984 }
 0x525   : > { %2772 = vrcp.f32 %v985_v18 }
 0x528   : > { %v1205_v19 = vpop.xlane.xlu0 %1204 }
 0x529   : > { %v1206_v20 = vsub.f32 %v1202_v14, %v1205_v19 }
 0x52b   : > { %v1207_v21 = vmul.f32 1.442695, %v1206_v20 }
 0x52c   : > { %v1053_v24 = vpop.permute.xlu0 %1052 }
 0x52d   : > { %2774 = vpow2.f32 %v1207_v21  ;;  %v1061_v26 = vsel %vm813_vm2, %v1053_v24, 0 }
 0x530   : > { %v1218_v42 = vpop.permute.xlu0 %1217 }
 0x531   : > { %v1223_v44 = vsel %vm880_vm3, %v1218_v42, 0 }
 0x532   : > { %v2773_v22 = vpop.eup %2772 }
 0x533   : > { %v987_v23 = vmul.f32 %v2773_v22, %v2771_v13 }
 0x534   : > { %v1323_v45 = vpop.permute.xlu0 %1322 }
 0x535   : > { %v990_v27 = vpack.c.bf16 %v987_v23, %v987_v23  ;;  %2376 = vst.msk [vmem:[%s3198_s25 + $0x8] sm:$0xff] %vm813_vm2, %v987_v23  ;;  %v1328_v47 = vsel %vm813_vm2, %v1323_v45, 0  ;;  %v2698_v45 = vld [vmem:[%s3510_s10 + $0x70] sm:$0xff]  }
 0x537   : > { %2552 = vmatmul.mubr.msk.bf16.vlgmr.msra.gmra.mxu1 %vm813_vm2, %v990_v27 }
 0x538   : > { %2556 = vmatpush3.bf16.xpose.msra.mxu1 %v1061_v26  ;;  %2559 = vmatprep.mubr.msk.bf16.mxu1 %vm2928_vm0, %v2927_v0  ;;  %v1321_v48 = vpop.permute.xlu0 %1320 }
 0x539   : > { %2557 = vmatprep.subr.bf16.mxu1 %v2927_v0 }
 0x53a   : > { %v2775_v28 = vpop.eup %2774 }
 0x53b   : > { %v1209_v29 = vsel %vm813_vm2, %v2775_v28, 0.0 }
 0x53c   : > { %1210 = vadd.xlane.f32.xlu1 %v1209_v29 }
 0x540   : > { %2558 = vmatpush3.bf16.xpose.msra.mxu1 %v1058_v31 }
 0x541   : > { %2563 = vmatprep.subr.bf16.mxu1 %v2927_v0 }
 0x5c5   : > { %v1211_v32 = vpop.xlane.xlu1 %1210 }
 0x5c6   : > { %2776 = vrcp.f32 %v1211_v32 }
 0x5d3   : > { %v2777_v33 = vpop.eup %2776 }
 0x5d4   : > { %v1213_v34 = vmul.f32 %v2777_v33, %v2775_v28 }
 0x5d6   : > { %2383 = vst.msk [vmem:[%s3198_s25 + $0x10] sm:$0xff] %vm813_vm2, %v1213_v34  ;;  %v1216_v46 = vpack.c.bf16 %v1213_v34, %v1213_v34 }
 0x5f7   : > { %v1033_v35 = vpop.f32.mrf.mxu1 }
 0x5f8   : > { %v1039_v36 = vpack.c.bf16 %v1033_v35, %v1033_v35 }
 0x5f9   : > { %v2553_v38 = vpop.f32.mrf.mxu1 }
 0x5fa   : > { %2560 = vmatmul.mubr.msk.bf16.vlgmr.msra.gmra.mxu1 %vm813_vm2, %v1039_v36 }
 0x5fb   : > { %2564 = vmatpush3.bf16.xpose.msra.mxu1 %v1110_v37  ;;  %v1036_v39 = vpop.f32.mrf.mxu1  ;;  %2567 = vmatprep.mubr.msk.bf16.mxu1 %vm2928_vm0, %v2927_v0 }
 0x5fc   : > { %2565 = vmatprep.subr.bf16.mxu1 %v2927_v0 }
 0x5fd   : > { %v2554_v40 = vpop.f32.mrf.mxu1 }
 0x603   : > { %2566 = vmatpush3.bf16.xpose.msra.mxu1 %v1107_v41 }
 0x604   : > { %2577 = vmatprep.subr.bf16.mxu1 %v2927_v0 }
 0x60a   : > { %2568 = vmatmul.mubr.msk.bf16.vlgmr.msra.gmra.mxu1 %vm813_vm2, %v924_v43  ;;  %v2696_v43 = vld [vmem:[%s3510_s10 + $0x78] sm:$0xff]  }
 0x60b   : > { %2578 = vmatpush3.bf16.msra.mxu1 %v1223_v44  ;;  %2579 = vmatprep.mubr.msk.bf16.mxu1 %vm2928_vm0, %v2927_v0  ;;  %v2697_v44 = vld [vmem:[%s3510_s10 + $0x38] sm:$0xff]  }
 0x60c   : > { %2591 = vmatprep.subr.bf16.mxu1 %v2927_v0 }
 0x612   : > { %2580 = vmatmul.mubr.msk.bf16.vlgmr.msra.gmra.mxu1 %vm813_vm2, %v1216_v46  ;;  %v1677_v46 = vsel %vm666_vm1, %v2697_v44, 0  ;;  %v2748_v44 = vld [vmem:[#allocation2 + $0xb0] ss:$8 sps:$4 sm:$0xff]  }
 0x613   : > { %2592 = vmatpush3.bf16.xpose.msra.mxu1 %v1328_v47  ;;  %2593 = vmatprep.mubr.msk.bf16.mxu1 %vm2928_vm0, %v2927_v0  ;;  %v2699_v47 = vld [vmem:[%s3510_s10 + $0x30] sm:$0xff]  }
 0x614   : > { %2597 = vmatprep.subr.bf16.mxu1 %v2927_v0 }
 0x61a   : > { %2594 = vmatmul.mubr.msk.bf16.vlgmr.msra.gmra.mxu1 %vm813_vm2, %v1321_v48  ;;  %v1674_v48 = vsel %vm666_vm1, %v2699_v47, 0  ;;  %v2756_v47 = vld [vmem:[#allocation2 + $0x94] ss:$8 sps:$4 sm:$0xff]  }
 0x61b   : > { %2599 = vmatprep.mubr.msk.bf16.mxu1 %vm2928_vm0, %v2927_v0 }
 0x6ba   : > { %v1097_v49 = vpop.f32.mrf.mxu1 }
 0x6bc   : > { %v2561_v50 = vpop.f32.mrf.mxu1 }
 0x6bd   : > { %v2701_v50 = vld [vmem:[%s3510_s10 + $0x28] sm:$0xff]  }
 0x6be   : > { %v1100_v51 = vpop.f32.mrf.mxu1 }
 0x6bf   : > { %v1671_v51 = vsel %vm666_vm1, %v2701_v50, 0  ;;  %v2757_v50 = vld [vmem:[#allocation2 + $0x80] ss:$8 sps:$4 sm:$0xff]  }
 0x6c0   : > { %v2562_v52 = vpop.f32.mrf.mxu1 }
 0x6c1   : > { %v2702_v52 = vld [vmem:[%s3510_s10 + $0x60] sm:$0xff]  }
 0x6ca   : > { %v1146_v53 = vpop.f32.mrf.mxu1 }
 0x6cb   : > { %v1147_v54 = vadd.f32 %v1146_v53, %v1097_v49  ;;  %v2700_v49 = vld [vmem:[%s3510_s10 + $0x68] sm:$0xff]   ;;  %v2703_v53 = vld [vmem:[%s3510_s10 + $0x20] sm:$0xff]  }
 0x6cc   : > { %v2569_v55 = vpop.f32.mrf.mxu1 }
 0x6cd   : > { %v2704_v55 = vld [vmem:[%s3510_s10 + $0x58] sm:$0xff]  }
 0x6ce   : > { %v1149_v56 = vpop.f32.mrf.mxu1 }
 0x6cf   : > { %v2705_v56 = vld [vmem:[%s3510_s10 + $0x18] sm:$0xff]  }
 0x6d0   : > { %v2570_v57 = vpop.f32.mrf.mxu1 }
 0x6d1   : > { %v1665_v57 = vsel %vm666_vm1, %v2705_v56, 0 }
 0x6d2   : > { %v1259_v58 = vpop.f32.mrf.mxu1 }
 0x6d3   : > { %v1265_v21 = vpack.c.bf16 %v1259_v58, %v1259_v58 }
 0x6d4   : > { %v2581_v59 = vpop.f32.mrf.mxu1 }
 0x6d6   : > { %v1262_v60 = vpop.f32.mrf.mxu1 }
 0x6d8   : > { %v2582_v61 = vpop.f32.mrf.mxu1 }
 0x6da   : > { %v1364_v62 = vpop.f32.mrf.mxu1 }
 0x6db   : > { %v1370_v63 = vmul.f32 0.35355338, %v1364_v62 }
 0x6dc   : > { %v2595_v1 = vpop.f32.mrf.mxu1 }
 0x6dd   : > { %v1371_v2 = vsel %vm813_vm2, %v1370_v63, -inf  ;;  %v2707_v1 = vld [vmem:[%s3510_s10 + $0x10] sm:$0xff]  }
 0x6de   : > { %1372 = vmax.xlane.f32.xlu0 %v1371_v2  ;;  %v1367_v3 = vpop.f32.mrf.mxu1  ;;  %v1662_v2 = vsel %vm666_vm1, %v2707_v1, 0 }
 0x6df   : > { %v2708_v3 = vld [vmem:[%s3510_s10 + $0x48] sm:$0xff]  }
 0x6e0   : > { %v2596_v4 = vpop.f32.mrf.mxu1 }
 0x6e1   : > { %v2709_v4 = vld [vmem:[%s3510_s10 + $0x8] sm:$0xff]  }
 0x6f4   : > { %1268 = vrot.lane.b32.xlu0 %v3233_v17, %s2931_s29 }
 0x767   : > { %v1373_v5 = vpop.xlane.xlu0 %1372 }
 0x768   : > { %v1374_v8 = vsub.f32 %v1370_v63, %v1373_v5  ;;  %v2706_v63 = vld [vmem:[%s3510_s10 + $0x50] sm:$0xff]   ;;  %v1659_v5 = vsel %vm666_vm1, %v2709_v4, 0 }
 0x76a   : > { %v1375_v9 = vmul.f32 1.442695, %v1374_v8  ;;  %v2710_v8 = vld [vmem:[%s3510_s10 + $0x40] sm:$0xff]  }
 0x76b   : > { %v1269_v12 = vpop.permute.xlu0 %1268 }
 0x76c   : > { %2778 = vpow2.f32 %v1375_v9  ;;  %v1277_v13 = vsel %vm813_vm2, %v1269_v12, 0  ;;  %v2711_v9 = vld [vmem:[%s3510_s10] sm:$0xff]   ;;  %v2714_v12 = vld [vmem:[#allocation2 + $0x74] ss:$8 sps:$4 sm:$0xff]  }
 0x76d   : > { %2584 = vmatpush3.bf16.xpose.msra.mxu0 %v1277_v13  ;;  %v2717_v13 = vld [vmem:[#allocation2 + $0x64] ss:$8 sps:$4 sm:$0xff]  }
 0x76e   : > { %2585 = vmatprep.subr.bf16.mxu0 %v2927_v0 }
 0x779   : > { %v2779_v10 = vpop.eup %2778 }
 0x77a   : > { %v1377_v11 = vsel %vm813_vm2, %v2779_v10, 0.0 }
 0x77b   : > { %1378 = vadd.xlane.f32.xlu1 %v1377_v11  ;;  %v2712_v11 = vld [vmem:[#allocation2 + $0x70] ss:$8 sps:$4 sm:$0xff]  }
 0x78c   : > { %1385 = vrot.lane.b32.xlu1 %v3167_v25, %s2935_s27 }
 0x790   : > { %1266 = vrot.lane.b32.xlu1 %v3222_v6, %s2931_s29  ;;  %s3432_s29 = scalar_lea.hbm %s3519_s19, %s2456_s26 }
 0x794   : > { %1436 = vrot.lane.b32.xlu1 %v3233_v17, %s2934_s24 }
 0x798   : > { %1434 = vrot.lane.b32.xlu1 %v3222_v6, %s2934_s24 }
 0x804   : > { %v1379_v14 = vpop.xlane.xlu1 %1378 }
 0x805   : > { %2780 = vrcp.f32 %v1379_v14  ;;  %v2715_v14 = vld [vmem:[#allocation2 + $0x60] ss:$8 sps:$4 sm:$0xff]  }
 0x808   : > { %v1386_v15 = vpop.permute.xlu1 %1385 }
 0x809   : > { %v1391_v16 = vsel %vm880_vm3, %v1386_v15, 0  ;;  %v2720_v15 = vld [vmem:[#allocation2 + $0x54] ss:$8 sps:$4 sm:$0xff]  }
 0x80a   : > { %2598 = vmatpush3.bf16.msra.mxu1 %v1391_v16  ;;  %v2718_v16 = vld [vmem:[#allocation2 + $0x50] ss:$8 sps:$4 sm:$0xff]  }
 0x80b   : > { %2611 = vmatprep.subr.msk.bf16.mxu1 %vm666_vm1, %v2696_v43  ;;  %v2745_v43 = vld [vmem:[#allocation2 + $0xc0] ss:$8 sps:$4 sm:$0xff]  }
 0x80c   : > { %v1267_v18 = vpop.permute.xlu1 %1266 }
 0x80d   : > { %v1274_v19 = vsel %vm813_vm2, %v1267_v18, 0  ;;  %v2723_v18 = vld [vmem:[#allocation2 + $0x44] ss:$8 sps:$4 sm:$0xff]  }
 0x80e   : > { %2586 = vmatpush3.bf16.xpose.msra.mxu0 %v1274_v19  ;;  %v2721_v19 = vld [vmem:[#allocation2 + $0x40] ss:$8 sps:$4 sm:$0xff]  }
 0x80f   : > { %2603 = vmatprep.subr.bf16.mxu0 %v2927_v0 }
 0x810   : > { %v1437_v25 = vpop.permute.xlu1 %1436 }
 0x811   : > { %v1445_v22 = vsel %vm813_vm2, %v1437_v25, 0  ;;  %v2726_v25 = vld [vmem:[#allocation2 + $0x34] ss:$8 sps:$4 sm:$0xff]  }
 0x812   : > { %v2781_v20 = vpop.eup %2780 }
 0x813   : > { %v1381_v17 = vmul.f32 %v2781_v20, %v2779_v10  ;;  %v1656_v10 = vsel %vm666_vm1, %v2711_v9, 0  ;;  %v2724_v20 = vld [vmem:[#allocation2 + $0x30] ss:$8 sps:$4 sm:$0xff]  }
 0x814   : > { %v1435_v23 = vpop.permute.xlu1 %1434 }
 0x815   : > { %2588 = vmatmul.mubr.msk.bf16.vlgmr.msra.gmra.mxu0 %vm813_vm2, %v1265_v21  ;;  %v1384_v6 = vpack.c.bf16 %v1381_v17, %v1381_v17  ;;  %2387 = vst.msk [vmem:[%s3198_s25 + $0x18] sm:$0xff] %vm813_vm2, %v1381_v17  ;;  %v1442_v24 = vsel %vm813_vm2, %v1435_v23, 0  ;;  %v2729_v21 = vld [vmem:[#allocation2 + $0x24] ss:$8 sps:$4 sm:$0xff]   ;;  %v2727_v17 = vld [vmem:[#allocation2 + $0x20] ss:$8 sps:$4 sm:$0xff]  }
 0x816   : > { %2604 = vmatpush3.bf16.xpose.msra.mxu0 %v1445_v22  ;;  %2607 = vmatprep.mubr.msk.bf16.mxu0 %vm2928_vm0, %v2927_v0  ;;  %v2732_v22 = vld [vmem:[#allocation2 + $0x14] ss:$8 sps:$4 sm:$0xff]   ;;  %v2735_v23 = vld [vmem:[#allocation2 + $0x4] ss:$8 sps:$4 sm:$0xff]   ;;  %s2834_s25 = scalar_lea.vmem %s2833_s4, 1024 }
 0x817   : > { %2600 = vmatmul.mubr.msk.bf16.vlgmr.msra.gmra.mxu1 %vm813_vm2, %v1384_v6  ;;  %2605 = vmatprep.subr.bf16.mxu0 %v2927_v0  ;;  %v2390_v0 = vld [vmem:[%s3507_s7] ss:$0 sm:$0xff]  ;;  %v2730_v6 = vld [vmem:[#allocation2 + $0x10] ss:$8 sps:$4 sm:$0xff]   ;;  %p2836_p12 = scmp.lt.s32.totalorder %s2834_s25, %s2828_s20 }
 0x818   : > { %2494 = vmatpush3.bf16.xpose.msra.mxu1 %v1677_v46  ;;  %v2751_v46 = vld [vmem:[#allocation2 + $0xa0] ss:$8 sps:$4 sm:$0xff]  }
 0x819   : > { %2612 = vmatprep.subr.msk.bf16.mxu1 %vm666_vm1, %v2698_v45  ;;  %v2753_v45 = vld [vmem:[#allocation2 + $0xa4] ss:$8 sps:$4 sm:$0xff]   ;;  %p2837_p13 = por %p2836_p12, %p2835_p11 }
 0x81b   : > { %p2838_p0 = pnand %p2837_p13, %p2831_p10 }
 0x81e   : > { %2606 = vmatpush3.bf16.xpose.msra.mxu0 %v1442_v24  ;;  %v2733_v24 = vld [vmem:[#allocation2] ss:$8 sps:$4 sm:$0xff]  }
 0x81f   : > { %2004 = vmatprep.subr.bf16.mxu0 %v2714_v12 }
 0x820   : > { %2496 = vmatpush3.bf16.xpose.msra.mxu1 %v1674_v48  ;;  %v2754_v48 = vld [vmem:[#allocation2 + $0x90] ss:$8 sps:$4 sm:$0xff]  }
 0x821   : > { %2613 = vmatprep.subr.msk.bf16.mxu1 %vm666_vm1, %v2700_v49  ;;  %v2759_v49 = vld [vmem:[#allocation2 + $0x84] ss:$8 sps:$4 sm:$0xff]  }
 0x828   : > { %2498 = vmatpush3.bf16.xpose.msra.mxu1 %v1671_v51  ;;  %v1562_v51 = vlaneseq }
 0x829   : > { %2614 = vmatprep.subr.msk.bf16.mxu1 %vm666_vm1, %v2702_v52 }
 0x82a   : > { %v3386_v52 = vshrl.u32 %v1562_v51, 7 }
 0x8d5   : > { %v1313_v26 = vpop.f32.mrf.mxu0 }
 0x8d6   : > { %v1319_v27 = vadd.f32 %v1313_v26, %v1147_v54  ;;  %v1668_v54 = vsel %vm666_vm1, %v2703_v53, 0  ;;  %v2738_v26 = vld [vmem:[#allocation2 + $0xf4] ss:$8 sps:$4 sm:$0xff]   ;;  %v1564_v53 = vsub.s32 0, %v3386_v52 }
 0x8d7   : > { %v2589_v28 = vpop.f32.mrf.mxu0  ;;  %v1427_v29 = vpop.f32.mrf.mxu1  ;;  %2500 = vmatpush3.bf16.xpose.msra.mxu1 %v1668_v54  ;;  %v1560_v54 = vld [vmem:[%s3511_s11] sm:$0x3] }
 0x8d8   : > { %v1433_v30 = vpack.c.bf16 %v1427_v29, %v1427_v29  ;;  %2615 = vmatprep.subr.msk.bf16.mxu1 %vm666_vm1, %v2704_v55  ;;  %v1568_v55 = vsub.s32 1, %v3386_v52  ;;  %v1565_v56 = vrot.slane %v1560_v54, %v1564_v53 }
 0x8d9   : > { %v1316_v31 = vpop.f32.mrf.mxu0  ;;  %v2601_v32 = vpop.f32.mrf.mxu1 }
 0x8da   : > { %2608 = vmatmul.mubr.msk.bf16.vlgmr.msra.gmra.mxu0 %vm813_vm2, %v1433_v30  ;;  %v2391_v32 = vld [vmem:[%s3508_s8] ss:$0 sm:$0xff] }
 0x8db   : > { %v2590_v33 = vpop.f32.mrf.mxu0  ;;  %v1430_v34 = vpop.f32.mrf.mxu1  ;;  %2005 = vmatpush1.bf16.xpose.msra.mxu0 %v2712_v11 }
 0x8dc   : > { %2006 = vmatprep.subr.bf16.mxu0 %v2717_v13  ;;  %v2392_v34 = vld [vmem:[%s3509_s9] ss:$0 sm:$0xff] }
 0x8dd   : > { %v2602_v35 = vpop.f32.mrf.mxu1 }
 0x8df   : > { %2502 = vmatpush3.bf16.xpose.msra.mxu1 %v1665_v57  ;;  %v1569_v57 = vrot.slane %v1560_v54, %v1568_v55 }
 0x8e0   : > { %2616 = vmatprep.subr.msk.bf16.mxu1 %vm666_vm1, %v2706_v63 }
 0x8e3   : > { %2007 = vmatpush1.bf16.xpose.msra.mxu0 %v2715_v14 }
 0x8e4   : > { %2008 = vmatprep.subr.bf16.mxu0 %v2720_v15 }
 0x8e7   : > { %2504 = vmatpush3.bf16.xpose.msra.mxu1 %v1662_v2 }
 0x8e8   : > { %2617 = vmatprep.subr.msk.bf16.mxu1 %vm666_vm1, %v2708_v3 }
 0x8eb   : > { %2009 = vmatpush1.bf16.xpose.msra.mxu0 %v2718_v16 }
 0x8ec   : > { %2010 = vmatprep.subr.bf16.mxu0 %v2723_v18 }
 0x8ef   : > { %2506 = vmatpush3.bf16.xpose.msra.mxu1 %v1659_v5 }
 0x8f0   : > { %2618 = vmatprep.subr.msk.bf16.mxu1 %vm666_vm1, %v2710_v8 }
 0x8f3   : > { %2011 = vmatpush1.bf16.xpose.msra.mxu0 %v2721_v19 }
 0x8f4   : > { %2012 = vmatprep.subr.bf16.mxu0 %v2726_v25 }
 0x8f7   : > { %2508 = vmatpush3.bf16.xpose.msra.mxu1 %v1656_v10 }
 0x8fb   : > { %2013 = vmatpush1.bf16.xpose.msra.mxu0 %v2724_v20 }
 0x8fc   : > { %2014 = vmatprep.subr.bf16.mxu0 %v2729_v21 }
 0x903   : > { %2015 = vmatpush1.bf16.xpose.msra.mxu0 %v2727_v17 }
 0x904   : > { %2016 = vmatprep.subr.bf16.mxu0 %v2732_v22 }
 0x90b   : > { %2017 = vmatpush1.bf16.xpose.msra.mxu0 %v2730_v6 }
 0x90c   : > { %2018 = vmatprep.subr.bf16.mxu0 %v2735_v23 }
 0x913   : > { %2019 = vmatpush1.bf16.xpose.msra.mxu0 %v2733_v24 }
 0x914   : > { %2020 = vmatprep.subr.bf16.mxu0 %v2738_v26 }
 0x99a   : > { %v1481_v36 = vpop.f32.mrf.mxu0 }
 0x99b   : > { %v1487_v37 = vadd.f32 %v1481_v36, %v1319_v27  ;;  %v2736_v27 = vld [vmem:[#allocation2 + $0xf0] ss:$8 sps:$4 sm:$0xff]  }
 0x99c   : > { %v2609_v38 = vpop.f32.mrf.mxu0  ;;  %2021 = vmatpush2.bf16.xpose.msra.mxu0 %v2736_v27 }
 0x99d   : > { %v1495_v39 = vadd.f32 %v2390_v0, %v1487_v37  ;;  %v2741_v38 = vld [vmem:[#allocation2 + $0xe4] ss:$8 sps:$4 sm:$0xff]  }
 0x99e   : > { %v1484_v40 = vpop.f32.mrf.mxu0  ;;  %2022 = vmatprep.subr.bf16.mxu0 %v2741_v38 }
 0x99f   : > { %v1498_v41 = vsel %vm666_vm1, %v1495_v39, 0.0  ;;  %v2744_v40 = vld [vmem:[#allocation2 + $0xd4] ss:$8 sps:$4 sm:$0xff]  }
 0x9a0   : > { %1499 = vadd.xlane.f32.xlu1 %v1498_v41  ;;  %v2610_v42 = vpop.f32.mrf.mxu0  ;;  %v2742_v41 = vld [vmem:[#allocation2 + $0xd0] ss:$8 sps:$4 sm:$0xff]  }
 0x9a1   : > { %v2747_v42 = vld [vmem:[#allocation2 + $0xc4] ss:$8 sps:$4 sm:$0xff]  }
 0xa29   : > { %v1500_v58 = vpop.xlane.xlu1 %1499 }
 0xa2a   : > { %v1502_v59 = vmul.f32 0.03125, %v1500_v58 }
 0xa2c   : > { %v1503_v60 = vsub.f32 %v1495_v39, %v1502_v59  ;;  %v2739_v39 = vld [vmem:[#allocation2 + $0xe0] ss:$8 sps:$4 sm:$0xff]  }
 0xa2d   : > { %2023 = vmatpush2.bf16.xpose.msra.mxu0 %v2739_v39 }
 0xa2e   : > { %v1504_v61 = vmul.f32 %v1503_v60, %v1503_v60  ;;  %2024 = vmatprep.subr.bf16.mxu0 %v2744_v40  ;;  %v2936_v40 = vmov -1.0  }
 0xa30   : > { %v1505_v62 = vsel %vm666_vm1, %v1504_v61, 0.0 }
 0xa31   : > { %1506 = vadd.xlane.f32.xlu0 %v1505_v62 }
 0xa35   : > { %2025 = vmatpush2.bf16.xpose.msra.mxu0 %v2742_v41 }
 0xa36   : > { %2026 = vmatprep.subr.bf16.mxu0 %v2747_v42 }
 0xa3d   : > { %2027 = vmatpush2.bf16.xpose.msra.mxu0 %v2745_v43 }
 0xaba   : > { %v1507_v28 = vpop.xlane.xlu0 %1506 }
 0xabb   : > { %v1508_v29 = vmul.f32 0.03125, %v1507_v28 }
 0xabd   : > { %v1509_v30 = vadd.f32 1e-06, %v1508_v29 }
 0xabf   : > { %2782 = vrsqrt.f32 %v1509_v30 }
 0xacc   : > { %v2783_v31 = vpop.eup %2782 }
 0xacd   : > { %v1511_v33 = vmul.f32 %v2783_v31, %v1503_v60 }
 0xacf   : > { %v1518_v35 = vmul.f32 %v2391_v32, %v1511_v33 }
 0xad1   : > { %v1525_v36 = vadd.f32 %v2392_v34, %v1518_v35 }
 0xad3   : > { %v3380_v0 = vadd.f32 %v1525_v36, %v3134_v7  ;;  %v2750_v7 = vld [vmem:[#allocation2 + $0xb4] ss:$8 sps:$4 sm:$0xff]  }
 0xad4   : > { %2028 = vmatprep.subr.bf16.mxu0 %v2750_v7 }
 0xad5   : > { %v1527_v37 = vpack.c.bf16 %v3380_v0, %v3380_v0  ;;  %2029 = vmatpush2.bf16.xpose.msra.mxu0 %v2748_v44 }
 0xad6   : > { %2030 = vmatprep.subr.bf16.mxu0 %v2753_v45 }
 0xad7   : > { %2509 = vmatprep.mubr.msk.bf16.mxu1 %vm666_vm1, %v1527_v37 }
 0xad8   : > { %2510 = vmatmul.mubr.msk.bf16.vlgmr.msra.gmra.mxu1 %vm666_vm1, %v1527_v37 }
 0xadd   : > { %2031 = vmatpush2.bf16.xpose.msra.mxu0 %v2751_v46 }
 0xade   : > { %2032 = vmatprep.subr.bf16.mxu0 %v2756_v47 }
 0xae5   : > { %2033 = vmatpush2.bf16.xpose.msra.mxu0 %v2754_v48 }
 0xae6   : > { %2034 = vmatprep.subr.bf16.mxu0 %v2759_v49 }
 0xaed   : > { %2035 = vmatpush2.bf16.xpose.msra.mxu0 %v2757_v50 }
 0xb98   : > { %v1737_v58 = vpop.f32.mrf.mxu1 }
 0xb99   : > { %v1738_v59 = vadd.f32 %v1737_v58, %v1565_v56  ;;  %v2760_v58 = vld [vmem:[%s3514_s14 + $0x10] ss:$8 sps:$4 sm:$0xff]  }
 0xb9a   : > { %v1739_v60 = vpop.f32.mrf.mxu1 }
 0xb9b   : > { %v1746_v61 = vmul.f32 0.70710677, %v1738_v59  ;;  %v1740_v62 = vadd.f32 %v1739_v60, %v1569_v57  ;;  %v1744_v47 = vmul.f32 0.5, %v1738_v59  ;;  %v2762_v57 = vld [vmem:[%s3514_s14 + $0x14] ss:$8 sps:$4 sm:$0xff]  }
 0xb9c   : > { %v1741_v63 = vpop.f32.mrf.mxu1  ;;  %2144 = vmatprep.subr.bf16.mxu1 %v2762_v57  ;;  %v2765_v59 = vld [vmem:[%s3514_s14 + $0x4] ss:$8 sps:$4 sm:$0xff]   ;;  %v2763_v60 = vld [vmem:[%s3514_s14] ss:$8 sps:$4 sm:$0xff]  }
 0xb9d   : > { %v1752_v1 = vand.u32 2147483647, %v1746_v61  ;;  %v1747_v2 = vmul.f32 0.70710677, %v1740_v62  ;;  %vm1748_vm4 = vcmp.ge.f32.partialorder %v1746_v61, 0.0  ;;  %v1745_v48 = vmul.f32 0.5, %v1740_v62  ;;  %2145 = vmatpush1.bf16.xpose.msra.mxu1 %v2760_v58 }
 0xb9e   : > { %v1742_v3 = vpop.f32.mrf.mxu1  ;;  %v1750_v41 = vsel %vm1748_vm4, 1.0, %v2936_v40  ;;  %2146 = vmatprep.subr.bf16.mxu1 %v2765_v59  ;;  %v1832_v61 = vld [vmem:[%s3513_s13] sm:$0x3] }
 0xb9f   : > { %v1754_v4 = vmul.f32 0.3275911, %v1752_v1  ;;  %v1753_v5 = vand.u32 2147483647, %v1747_v2  ;;  %v1780_v11 = vsub.f32 0.0, %v1752_v1  ;;  %vm1749_vm5 = vcmp.ge.f32.partialorder %v1747_v2, 0.0 }
 0xba0   : > { %v1751_v45 = vsel %vm1749_vm5, 1.0, %v2936_v40  ;;  %v1837_v62 = vrot.slane %v1832_v61, %v1564_v53  ;;  %v1841_v63 = vrot.slane %v1832_v61, %v1568_v55 }
 0xba1   : > { %v1756_v8 = vadd.f32 1.0, %v1754_v4  ;;  %v1755_v9 = vmul.f32 0.3275911, %v1753_v5  ;;  %v1781_v12 = vsub.f32 0.0, %v1753_v5  ;;  %v1782_v13 = vmul.f32 %v1780_v11, %v1752_v1 }
 0xba3   : > { %2784 = vrcp.f32 %v1756_v8  ;;  %v1757_v10 = vadd.f32 1.0, %v1755_v9  ;;  %v1783_v15 = vmul.f32 %v1781_v12, %v1753_v5  ;;  %v1784_v18 = vmul.f32 1.442695, %v1782_v13 }
 0xba5   : > { %2786 = vrcp.f32 %v1757_v10  ;;  %v1786_v21 = vmul.f32 1.442695, %v1783_v15  ;;  %2147 = vmatpush1.bf16.xpose.msra.mxu1 %v2763_v60  ;;  %v2442_v60 = vld [vmem:[%s3515_s15] ss:$0 sm:$0xff] }
 0xba6   : > { %2788 = vpow2.f32 %v1784_v18 }
 0xba7   : > { %2790 = vpow2.f32 %v1786_v21 }
 0xbb0   : > { %v2785_v14 = vpop.eup %2784 }
 0xbb1   : > { %v1762_v16 = vmul.f32 1.0614054, %v2785_v14 }
 0xbb2   : > { %v2787_v19 = vpop.eup %2786 }
 0xbb3   : > { %v1764_v25 = vadd.f32 -1.4531521, %v1762_v16  ;;  %v1763_v20 = vmul.f32 1.0614054, %v2787_v19  ;;  %v2789_v34 = vpop.eup %2788 }
 0xbb4   : > { %v2791_v38 = vpop.eup %2790 }
 0xbb5   : > { %v1766_v17 = vmul.f32 %v2785_v14, %v1764_v25  ;;  %v1765_v22 = vadd.f32 -1.4531521, %v1763_v20 }
 0xbb7   : > { %v1768_v6 = vadd.f32 1.4214138, %v1766_v17  ;;  %v1767_v23 = vmul.f32 %v2787_v19, %v1765_v22 }
 0xbb9   : > { %v1770_v24 = vmul.f32 %v2785_v14, %v1768_v6  ;;  %v1769_v26 = vadd.f32 1.4214138, %v1767_v23 }
 0xbbb   : > { %v1772_v27 = vadd.f32 -0.28449672, %v1770_v24  ;;  %v1771_v28 = vmul.f32 %v2787_v19, %v1769_v26 }
 0xbbd   : > { %v1774_v29 = vmul.f32 %v2785_v14, %v1772_v27  ;;  %v1773_v30 = vadd.f32 -0.28449672, %v1771_v28 }
 0xbbf   : > { %v1776_v31 = vadd.f32 0.2548296, %v1774_v29  ;;  %v1775_v32 = vmul.f32 %v2787_v19, %v1773_v30 }
 0xbc1   : > { %v1778_v33 = vmul.f32 %v2785_v14, %v1776_v31  ;;  %v1777_v35 = vadd.f32 0.2548296, %v1775_v32 }
 0xbc3   : > { %v1788_v36 = vmul.f32 %v2789_v34, %v1778_v33  ;;  %v1779_v37 = vmul.f32 %v2787_v19, %v1777_v35 }
 0xbc5   : > { %v1790_v39 = vsub.f32 1.0, %v1788_v36  ;;  %v1789_v42 = vmul.f32 %v2791_v38, %v1779_v37 }
 0xbc7   : > { %v1792_v43 = vmul.f32 %v1790_v39, %v1750_v41  ;;  %v1791_v7 = vsub.f32 1.0, %v1789_v42 }
 0xbc9   : > { %v1794_v44 = vadd.f32 1.0, %v1792_v43  ;;  %v1793_v46 = vmul.f32 %v1791_v7, %v1751_v45 }
 0xbcb   : > { %v1795_v49 = vadd.f32 1.0, %v1793_v46  ;;  %v1796_v50 = vmul.f32 %v1794_v44, %v1744_v47 }
 0xbcd   : > { %v1797_v51 = vmul.f32 %v1795_v49, %v1745_v48  ;;  %v1798_v56 = vpack.c.bf16 %v1796_v50, %v1796_v50 }
 0xbcf   : > { %v1799_v54 = vpack.c.bf16 %v1797_v51, %v1797_v51 }
 0xbd1   : > { %2036 = vmatprep.mubr.bf16.mxu0 %v1799_v54 }
 0xbd2   : > { %2037 = vmatmul.mubr.bf16.vlgmr.msra.gmra.mxu0 %v1798_v56 }
 0xc92   : > { %v2038_v1 = vpop.f32.mrf.mxu0 }
 0xc93   : > { %v2039_v2 = vadd.f32 %v2038_v1, %v1837_v62 }
 0xc94   : > { %v2040_v3 = vpop.f32.mrf.mxu0 }
 0xc95   : > { %v2047_v4 = vmul.f32 0.70710677, %v2039_v2  ;;  %v2041_v5 = vadd.f32 %v2040_v3, %v1841_v63  ;;  %v2045_v50 = vmul.f32 0.5, %v2039_v2 }
 0xc96   : > { %v2042_v8 = vpop.f32.mrf.mxu0 }
 0xc97   : > { %v2053_v9 = vand.u32 2147483647, %v2047_v4  ;;  %v2048_v10 = vmul.f32 0.70710677, %v2041_v5  ;;  %vm2049_vm6 = vcmp.ge.f32.partialorder %v2047_v4, 0.0  ;;  %v2046_v51 = vmul.f32 0.5, %v2041_v5 }
 0xc98   : > { %v2043_v11 = vpop.f32.mrf.mxu0  ;;  %v2051_v7 = vsel %vm2049_vm6, 1.0, %v2936_v40 }
 0xc99   : > { %v2055_v12 = vmul.f32 0.3275911, %v2053_v9  ;;  %v2054_v13 = vand.u32 2147483647, %v2048_v10  ;;  %v2081_v53 = vsub.f32 0.0, %v2053_v9  ;;  %vm2050_vm7 = vcmp.ge.f32.partialorder %v2048_v10, 0.0 }
 0xc9a   : > { %v2052_v48 = vsel %vm2050_vm7, 1.0, %v2936_v40 }
 0xc9b   : > { %v2057_v14 = vadd.f32 1.0, %v2055_v12  ;;  %v2056_v15 = vmul.f32 0.3275911, %v2054_v13  ;;  %v2082_v18 = vsub.f32 0.0, %v2054_v13  ;;  %v2083_v52 = vmul.f32 %v2081_v53, %v2053_v9 }
 0xc9d   : > { %2792 = vrcp.f32 %v2057_v14  ;;  %v2058_v16 = vadd.f32 1.0, %v2056_v15  ;;  %v2084_v19 = vmul.f32 %v2082_v18, %v2054_v13  ;;  %v2085_v20 = vmul.f32 1.442695, %v2083_v52 }
 0xc9f   : > { %2794 = vrcp.f32 %v2058_v16  ;;  %v2087_v6 = vmul.f32 1.442695, %v2084_v19 }
 0xca0   : > { %2796 = vpow2.f32 %v2085_v20 }
 0xca1   : > { %2798 = vpow2.f32 %v2087_v6 }
 0xcaa   : > { %v2793_v55 = vpop.eup %2792 }
 0xcab   : > { %v2063_v25 = vmul.f32 1.0614054, %v2793_v55 }
 0xcac   : > { %v2795_v21 = vpop.eup %2794 }
 0xcad   : > { %v2065_v17 = vadd.f32 -1.4531521, %v2063_v25  ;;  %v2064_v22 = vmul.f32 1.0614054, %v2795_v21  ;;  %v2797_v37 = vpop.eup %2796 }
 0xcae   : > { %v2799_v42 = vpop.eup %2798 }
 0xcaf   : > { %v2067_v23 = vmul.f32 %v2793_v55, %v2065_v17  ;;  %v2066_v24 = vadd.f32 -1.4531521, %v2064_v22 }
 0xcb1   : > { %v2069_v26 = vadd.f32 1.4214138, %v2067_v23  ;;  %v2068_v27 = vmul.f32 %v2795_v21, %v2066_v24 }
 0xcb3   : > { %v2071_v28 = vmul.f32 %v2793_v55, %v2069_v26  ;;  %v2070_v29 = vadd.f32 1.4214138, %v2068_v27 }
 0xcb5   : > { %v2073_v30 = vadd.f32 -0.28449672, %v2071_v28  ;;  %v2072_v31 = vmul.f32 %v2795_v21, %v2070_v29 }
 0xcb7   : > { %v2075_v32 = vmul.f32 %v2793_v55, %v2073_v30  ;;  %v2074_v33 = vadd.f32 -0.28449672, %v2072_v31 }
 0xcb9   : > { %v2077_v34 = vadd.f32 0.2548296, %v2075_v32  ;;  %v2076_v35 = vmul.f32 %v2795_v21, %v2074_v33 }
 0xcbb   : > { %v2079_v36 = vmul.f32 %v2793_v55, %v2077_v34  ;;  %v2078_v38 = vadd.f32 0.2548296, %v2076_v35 }
 0xcbd   : > { %v2089_v39 = vmul.f32 %v2797_v37, %v2079_v36  ;;  %v2080_v41 = vmul.f32 %v2795_v21, %v2078_v38 }
 0xcbf   : > { %v2091_v43 = vsub.f32 1.0, %v2089_v39  ;;  %v2090_v44 = vmul.f32 %v2799_v42, %v2080_v41 }
 0xcc1   : > { %v2093_v45 = vmul.f32 %v2091_v43, %v2051_v7  ;;  %v2092_v46 = vsub.f32 1.0, %v2090_v44 }
 0xcc3   : > { %v2095_v47 = vadd.f32 1.0, %v2093_v45  ;;  %v2094_v49 = vmul.f32 %v2092_v46, %v2052_v48 }
 0xcc5   : > { %v2096_v54 = vadd.f32 1.0, %v2094_v49  ;;  %v2097_v56 = vmul.f32 %v2095_v47, %v2045_v50 }
 0xcc7   : > { %v2098_v57 = vmul.f32 %v2096_v54, %v2046_v51  ;;  %v2099_v59 = vpack.c.bf16 %v2097_v56, %v2097_v56 }
 0xcc9   : > { %v2100_v58 = vpack.c.bf16 %v2098_v57, %v2098_v57 }
 0xccb   : > { %2164 = vmatprep.mubr.bf16.mxu1 %v2100_v58 }
 0xccc   : > { %2165 = vmatmul.mubr.bf16.vlgmr.msra.gmra.mxu1 %v2099_v59 }
 0xd8c   : > { %v2166_v61 = vpop.f32.mrf.mxu1 }
 0xd8d   : > { %v2167_v62 = vadd.f32 %v2442_v60, %v2166_v61 }
 0xd8e   : > { %v2168_v40 = vpop.f32.mrf.mxu1 }
 0xd8f   : > { %v2174_v63 = vsel %vm666_vm1, %v2167_v62, 0.0 }
 0xd90   : > { %v2169_v1 = vpop.f32.mrf.mxu1  ;;  %2175 = vadd.xlane.f32.xlu1 %v2174_v63 }
 0xd92   : > { %v2170_v2 = vpop.f32.mrf.mxu1 }
 0xe19   : > { %v2176_v3 = vpop.xlane.xlu1 %2175 }
 0xe1a   : > { %v2177_v4 = vmul.f32 0.03125, %v2176_v3 }
 0xe1c   : > { %v2178_v5 = vsub.f32 %v2167_v62, %v2177_v4 }
 0xe1e   : > { %v2179_v8 = vmul.f32 %v2178_v5, %v2178_v5 }
 0xe20   : > { %v2180_v9 = vsel %vm666_vm1, %v2179_v8, 0.0 }
 0xe21   : > { %2181 = vadd.xlane.f32.xlu1 %v2180_v9 }
 0xe22   : > { %2841 = shalt.err (!%p2838_p0)
}
 0xe23   : > { %s2842_s0 = scalar_lea.hbm %s3432_s29, 512  ;;  %s2846_s27 = scalar_lea.hbm %s3519_s19, 1024 }
 0xe24   : > { %p2843_p1 = scmp.ne.s32.totalorder %s3432_s29, %s2842_s0  ;;  %p2847_p4 = scmp.lt.s32.totalorder %s3432_s29, %s3519_s19 }
 0xe25   : > { %p2848_p7 = scmp.lt.s32.totalorder %s2846_s27, %s2842_s0 }
 0xe26   : > { %p2844_p2 = pnand %p2843_p1, %p3079_p5 }
 0xe27   : > { %p2849_p6 = por %p2848_p7, %p2847_p4 }
 0xe28   : > { %p2845_p3 = pneg %p2844_p2 }
 0xe2a   : > { %p2850_p8 = pnand %p2849_p6, %p2845_p3 }
 0xe2c   : > { %2853 = shalt.err (!%p2850_p8)
}
 0xe2d   : > { %s2938_s20 = smov 128   ;;  %s2939_s4 = smov 8   ;;  %v2447_v14 = vld [vmem:[%s3516_s16] ss:$0 sm:$0xff] }
 0xe2e   : > { %s3546_s25 = scalar_lea.sflag [#allocation7], %s3195_s22  ;;  %s2359_s12 = sshll.u32 %s3195_s22, 3  ;;  %v2448_v16 = vld [vmem:[%s3517_s17] ss:$0 sm:$0xff] }
 0xe2f   : > { %2624 = dma.vmem_to_hbm [thread:$0]  (%p3079_p5), %s3427_s2, 512, %s3432_s29, %s3546_s25, %s2938_s20, %s2938_s20, %s2939_s4  }
 0xe30   : > { %s2451_s23 = sshll.u32 %s3062_s1, 7  ;;  %s625_s2 = scalar_lea.vmem [#allocation5], %s2359_s12 }
 0xe31   : > { %s2222_s29 = sshll.u32 %s625_s2, 4  ;;  %s2220_s25 = scalar_lea.hbm %s3518_s18, %s2451_s23  ;;  %s2223_s29 = int_to_ptr.vmem [resolvable:$true] %s2222_s29 }
 0xe32   : > { %s2204_s0 = scalar_lea.sflag [#allocation4], %s3195_s22  ;;  %s2854_s26 = scalar_lea.vmem %s2223_s29, 128 }
 0xe33   : > { %p2855_p9 = scmp.ne.s32.totalorder %s2223_s29, %s2854_s26  ;;  %s2940_s24 = smov [#allocation5]  }
 0xe34   : > { %s2858_s1 = sshll.u32 %s2940_s24, 4  ;;  %s2859_s1 = int_to_ptr.vmem [resolvable:$false] %s2858_s1 }
 0xe35   : > { %p2856_p10 = pnand %p2855_p9, %p3079_p5  ;;  %s2860_s12 = scalar_lea.vmem %s2859_s1, 256 }
 0xe36   : > { %p2861_p12 = scmp.lt.s32.totalorder %s2223_s29, %s2859_s1  ;;  %p2862_p13 = scmp.lt.s32.totalorder %s2860_s12, %s2854_s26 }
 0xe37   : > { %p2857_p11 = pneg %p2856_p10 }
 0xe38   : > { %p2863_p0 = por %p2862_p13, %p2861_p12 }
 0xe3a   : > { %p2864_p1 = pnand %p2863_p0, %p2857_p11 }
 0xeaa   : > { %v2182_v10 = vpop.xlane.xlu1 %2181 }
 0xeab   : > { %v2183_v11 = vmul.f32 0.03125, %v2182_v10 }
 0xead   : > { %v2184_v12 = vadd.f32 1e-06, %v2183_v11 }
 0xeaf   : > { %2800 = vrsqrt.f32 %v2184_v12 }
 0xebc   : > { %v2801_v13 = vpop.eup %2800 }
 0xebd   : > { %v2186_v15 = vmul.f32 %v2801_v13, %v2178_v5 }
 0xebf   : > { %v2193_v53 = vmul.f32 %v2447_v14, %v2186_v15 }
 0xec1   : > { %v2200_v18 = vadd.f32 %v2448_v16, %v2193_v53 }
 0xec3   : > { %v2201_v52 = vadd.f32 %v2200_v18, %v3380_v0 }
 0xec5   : > { %2202 = vst.msk [vmem:[%s625_s2] sm:$0xff] %vm666_vm1, %v2201_v52 }
 0xec6   : > { %2867 = shalt.err (!%p2864_p1)
}
 0xec7   : > { %s2868_s27 = scalar_lea.hbm %s2220_s25, 128  ;;  %s2872_s2 = scalar_lea.hbm %s3518_s18, 256 }
 0xec8   : > { %p2869_p2 = scmp.ne.s32.totalorder %s2220_s25, %s2868_s27  ;;  %p2873_p7 = scmp.lt.s32.totalorder %s2220_s25, %s3518_s18 }
 0xec9   : > { %p2874_p6 = scmp.lt.s32.totalorder %s2872_s2, %s2868_s27 }
 0xeca   : > { %p2870_p3 = pnand %p2869_p2, %p3079_p5 }
 0xecb   : > { %p2875_p8 = por %p2874_p6, %p2873_p7 }
 0xecc   : > { %p2871_p4 = pneg %p2870_p3 }
 0xece   : > { %p2876_p9 = pnand %p2875_p8, %p2871_p4 }
 0xed0   : > { %2879 = shalt.err (!%p2876_p9)
}
 0xed1   : > { %2623 = dma.vmem_to_hbm [thread:$0]  (%p3079_p5), %s2223_s29, 128, %s2220_s25, %s2204_s0  }
 0xed2 PF: > { %s3547_s26 = sld [smem:[#allocation11_spill]]  ;;  %p2640_p10 = scmp.ge.s32.totalorder %s2922_s21, 2 }
 0xed3   : > { %s3548_s24 = sld [smem:[#allocation15_spill]] }
 0xed8   : > { %s2250_s1 = sand.u32 1, %s3547_s26  }
 0xed9   : > { %p3549_p11 = scmp.ne.s32.totalorder %s3548_s24, 0  ;;  %s2251_s12 = scalar_lea.sflag [#allocation4], %s2250_s1 }
 0xedb   : > { %p2632_p12 = pnand %p2640_p10, %p3549_p11 }
 0xedd   : > { %p2633_p13 = pneg %p2632_p12 }
 0xedf   : > { %2901 = dma.done.wait (%p2633_p13), %s2251_s12, 128  }
 0xee0   : > { %2903 = vsyncadd (%p2633_p13), %s2251_s12, 4294967168  ;;  %s2260_s22 = scalar_lea.sflag [#allocation7], %s2250_s1 }
 0xee1   : > { %2905 = dma.done.wait (%p2633_p13), %s2260_s22, 512  }
 0xee2   : > { %2907 = vsyncadd (%p2633_p13), %s2260_s22, 4294966784  ;;  %s3550_s21 = sld [smem:[#allocation13_spill]]  ;;  %s3553_s0 = smov %s2914_s30 }
 0xee3   : > { %s3551_s27 = sld [smem:[#allocation12_spill]] }
 0xee4   : > { %s3552_s20 = sld [smem:[#allocation14_spill]] }
 0xee8   : > { %p34_p5 = scmp.ge.s32.totalorder %s3550_s21, 4  }
 0xee9   : > { %s3554_s30 = smov %s3551_s27 }
 0xeea   :  { %36 = sbr.rel (!%p34_p5) target bundleno = 13 (0xd), region = 155 }
 0xeef   :  { %2265 = vsyncpa [#allocation3], 1 }
 0xef0   :  { %2267 = vsyncpa [#allocation3 + $0x1], 1 }
 0xef1   :  { %2268 = vsyncpa [#allocation4], 1 }
 0xef2   :  { %2270 = vsyncpa [#allocation4 + $0x1], 1 }
 0xef3   :  { %2271 = vsyncpa [#allocation7], 1 }
 0xef4   :  { %2273 = vsyncpa [#allocation7 + $0x1], 1 }

</bundles_post_ra>
